<compile_context>
chip_gen: v7x
topology: tpu7x:2x2x1
jax: 0.10.0
libtpu: 0.0.40
codegen_flags: <defaults>
</compile_context>

<pallas_src>
import jax
import jax.numpy as jnp
from jax.experimental import pallas as pl
from jax.experimental.pallas import tpu as pltpu


H1 = 1500          # hidden size of first bond layer  ('moderate')
H2 = 1000          # hidden size of second bond layer (last_fdim)
OUT = 2            # per-task head output dim
H1_PAD = 1536      # 12 * 128  (lane-aligned)
H2_PAD = 1024      # 8  * 128  (lane-aligned)


def _mtdnn_kernel(x_ref, w1_ref, b1_ref, w2_ref, b2_ref, hw_ref, hb_ref,
                  out_ref, h1_ref, h2_ref):
    """Grid axis streams output-dim tiles of w2; h1 and h2 tiles stay VMEM-resident."""
    n = pl.program_id(0)
    n_tiles = h2_ref.shape[0]          # static
    tn = w2_ref.shape[1]               # static

    # First grid step: compute h1 once and keep it resident in VMEM.
    @pl.when(n == 0)
    def _():
        h1 = jnp.dot(x_ref[...], w1_ref[...],
                     preferred_element_type=jnp.float32) + b1_ref[...]
        # TODO(synk): nn.Dropout(p=0.5) treated as inference-mode identity (no RNG mask).
        h1_ref[...] = jnp.maximum(h1, 0.0).astype(jnp.bfloat16)

    # Layer-2 tile: (B, H1_PAD) @ (H1_PAD, tn) -> (B, tn), +bias, ReLU, park in scratch.
    h2 = jnp.dot(h1_ref[...], w2_ref[...],
                 preferred_element_type=jnp.float32) + b2_ref[n]
    h2_ref[n] = jnp.maximum(h2, 0.0).astype(jnp.bfloat16)

    # Last grid step: one fused head matmul over all resident h2 tiles, single store.
    @pl.when(n == n_tiles - 1)
    def _():
        acc = jnp.zeros(out_ref.shape, jnp.float32)
        for t in range(n_tiles):                       # static unroll
            acc = acc + jnp.dot(h2_ref[t], hw_ref[t * tn:(t + 1) * tn, :],
                                preferred_element_type=jnp.float32)
        out_ref[...] = acc + hb_ref[...]


def prepare_params(w1, b1, w2, b2, hw, hb):
    """Pad to lane multiples, cast weights to bf16, fuse heads. Done once host-side."""
    in_fdim = w1.shape[0]
    num_tasks = hw.shape[0]
    head_dim = num_tasks * OUT
    head_pad = pl.cdiv(head_dim, 128) * 128

    bf = jnp.bfloat16
    w1_p = jnp.zeros((in_fdim, H1_PAD), bf).at[:, :H1].set(w1.astype(bf))
    b1_p = jnp.zeros((1, H1_PAD), jnp.float32).at[:, :H1].set(b1[None, :])
    w2_p = jnp.zeros((H1_PAD, H2_PAD), bf).at[:H1, :H2].set(w2.astype(bf))
    b2_p = jnp.zeros((1, H2_PAD), jnp.float32).at[:, :H2].set(b2[None, :])

    # Fuse heads: hw (T, H2, 2) -> (H2, T*2) so hw_f[:, t*2:(t+1)*2] == hw[t].
    hw_f = jnp.transpose(hw, (1, 0, 2)).reshape(H2, head_dim)
    hw_p = jnp.zeros((H2_PAD, head_pad), bf).at[:H2, :head_dim].set(hw_f.astype(bf))
    hb_p = jnp.zeros((1, head_pad), jnp.float32).at[:, :head_dim].set(
        hb.reshape(1, head_dim))

    return dict(w1=w1_p, b1=b1_p, w2=w2_p, b2=b2_p, hw=hw_p, hb=hb_p,
                num_tasks=num_tasks, head_pad=head_pad)


def mt_dnn_forward(x, params, *, tn=512):
    """Runs the Pallas kernel; returns (B, num_tasks*2) fused logits."""
    B, in_fdim = x.shape
    num_tasks = params["num_tasks"]
    head_pad = params["head_pad"]
    assert H2_PAD % tn == 0 and tn % 128 == 0
    n_tiles = H2_PAD // tn

    # Pad batch to a multiple of 16 (full bf16/f32 sublane packing, unmasked stores).
    B_PAD = pl.cdiv(B, 16) * 16
    x_bf = jnp.zeros((B_PAD, in_fdim), jnp.bfloat16).at[:B].set(x.astype(jnp.bfloat16))

    # b2 resident across the grid, indexed per-step on the leading (tile) axis.
    b2_t = params["b2"].reshape(n_tiles, 1, tn)

    out = pl.pallas_call(
        _mtdnn_kernel,
        out_shape=jax.ShapeDtypeStruct((B_PAD, head_pad), jnp.float32),
        grid=(n_tiles,),
        in_specs=[
            pl.BlockSpec((B_PAD, in_fdim),   lambda n: (0, 0)),      # x   (resident)
            pl.BlockSpec((in_fdim, H1_PAD),  lambda n: (0, 0)),      # w1  (resident)
            pl.BlockSpec((1, H1_PAD),        lambda n: (0, 0)),      # b1  (resident)
            pl.BlockSpec((H1_PAD, tn),       lambda n: (0, n)),      # w2  (streamed)
            pl.BlockSpec((n_tiles, 1, tn),   lambda n: (0, 0, 0)),   # b2  (resident)
            pl.BlockSpec((H2_PAD, head_pad), lambda n: (0, 0)),      # hw  (resident)
            pl.BlockSpec((1, head_pad),      lambda n: (0, 0)),      # hb  (resident)
        ],
        out_specs=pl.BlockSpec((B_PAD, head_pad), lambda n: (0, 0)),
        scratch_shapes=[
            pltpu.VMEM((B_PAD, H1_PAD), jnp.bfloat16),        # h1 kept across tiles
            pltpu.VMEM((n_tiles, B_PAD, tn), jnp.bfloat16),   # parked h2 tiles
        ],
        compiler_params=pltpu.CompilerParams(
            dimension_semantics=("arbitrary",),   # sequential: scratch carries state
            vmem_limit_bytes=32 * 1024 * 1024),
    )(x_bf, params["w1"], params["b1"], params["w2"], b2_t,
      params["hw"], params["hb"])

    # Drop batch + lane padding; caller splits per-task lazily if needed.
    return out[:B, :num_tasks * OUT]


def split_tasks(fused, num_tasks):
    return [fused[:, t * OUT:(t + 1) * OUT] for t in range(num_tasks)]


def _torch_linear_init(key, fan_in, fan_out):
    """Deterministic PyTorch-style nn.Linear init: U(-1/sqrt(fan_in), 1/sqrt(fan_in))."""
    kw, kb = jax.random.split(key)
    bound = 1.0 / jnp.sqrt(float(fan_in))
    w = jax.random.uniform(kw, (fan_in, fan_out), jnp.float32, -bound, bound)
    b = jax.random.uniform(kb, (fan_out,), jnp.float32, -bound, bound)
    return w, b


def _reference_f32(x, w1, b1, w2, b2, hw, hb):
    h1 = jnp.maximum(x @ w1 + b1, 0.0)
    h2 = jnp.maximum(h1 @ w2 + b2, 0.0)
    return [h2 @ hw[t] + hb[t] for t in range(hw.shape[0])]


def _reference_bf16(x, w1, b1, w2, b2, hw, hb):
    """Same cast pattern as the kernel (bf16 operands, f32 accumulation)."""
    bf, f32 = jnp.bfloat16, jnp.float32
    h1 = jnp.maximum(
        jnp.dot(x.astype(bf), w1.astype(bf), preferred_element_type=f32) + b1, 0.0)
    h1 = h1.astype(bf)
    h2 = jnp.maximum(
        jnp.dot(h1, w2.astype(bf), preferred_element_type=f32) + b2, 0.0)
    h2 = h2.astype(bf)
    return [jnp.dot(h2, hw[t].astype(bf), preferred_element_type=f32) + hb[t]
            for t in range(hw.shape[0])]


if __name__ == "__main__":
    # Small synthetic setup consistent with the module:
    #   in_fdim=32, batch=4, task_ids=[0,1,2] -> num_tasks=3, layer_size='moderate'
    B = 4
    IN_FDIM = 32
    NUM_TASKS = 3

    root = jax.random.PRNGKey(0)
    kx, k1, k2, *khs = jax.random.split(root, 3 + NUM_TASKS)

    x = jax.random.normal(kx, (B, IN_FDIM), jnp.float32)

    w1, b1 = _torch_linear_init(k1, IN_FDIM, H1)
    w2, b2 = _torch_linear_init(k2, H1, H2)
    head_ws, head_bs = [], []
    for kh in khs:
        hw_t, hb_t = _torch_linear_init(kh, H2, OUT)
        head_ws.append(hw_t)
        head_bs.append(hb_t)
    hw = jnp.stack(head_ws, axis=0)          # (num_tasks, H2, 2)
    hb = jnp.stack(head_bs, axis=0)          # (num_tasks, 2)

    params = prepare_params(w1, b1, w2, b2, hw, hb)

    fused = mt_dnn_forward(x, params)
    fused = jax.block_until_ready(fused)
    outs = split_tasks(fused, NUM_TASKS)

    refs_bf16 = _reference_bf16(x, w1, b1, w2, b2, hw, hb)
    refs_f32 = _reference_f32(x, w1, b1, w2, b2, hw, hb)
    for o, rb, rf in zip(outs, refs_bf16, refs_f32):
        assert o.shape == (B, OUT)
        # Tight check vs a reference that uses the same bf16/f32 recipe.
        assert jnp.allclose(o, rb, atol=2e-3, rtol=2e-3), "mismatch vs bf16 reference"
        # Loose check vs the full-f32 PyTorch-equivalent reference.
        assert jnp.allclose(o, rf, atol=5e-2, rtol=5e-2), "mismatch vs f32 reference"

    print("KERNEL_OK")
</pallas_src>

<mosaic_0001>
module attributes {stable_mosaic.version = 11 : i64} {
  func.func @_mtdnn_kernel(%arg0: i32, %arg1: memref<16x32xbf16, #tpu.memory_space<vmem>>, %arg2: memref<32x1536xbf16, #tpu.memory_space<vmem>>, %arg3: memref<1x1536xf32, #tpu.memory_space<vmem>>, %arg4: memref<1536x512xbf16, #tpu.memory_space<vmem>>, %arg5: memref<2x1x512xf32, #tpu.memory_space<vmem>>, %arg6: memref<1024x128xbf16, #tpu.memory_space<vmem>>, %arg7: memref<1x128xf32, #tpu.memory_space<vmem>>, %arg8: memref<16x128xf32, #tpu.memory_space<vmem>>, %arg9: memref<16x1536xbf16, #tpu.memory_space<vmem>>, %arg10: memref<2x16x512xbf16, #tpu.memory_space<vmem>>) attributes {dimension_semantics = [#tpu.dimension_semantics<arbitrary>], iteration_bounds = array<i64: 2>, scalar_prefetch = 0 : i64, scratch_operands = 2 : i64, tpu.core_type = #tpu.core_type<tc>, window_params = [{pipeline_mode = #tpu.pipeline_mode<synchronous>, transform_indices = @transform_0, window_bounds = array<i64: 16, 32>}, {pipeline_mode = #tpu.pipeline_mode<synchronous>, transform_indices = @transform_1, window_bounds = array<i64: 32, 1536>}, {pipeline_mode = #tpu.pipeline_mode<synchronous>, transform_indices = @transform_2, window_bounds = array<i64: 1, 1536>}, {transform_indices = @transform_3, window_bounds = array<i64: 1536, 512>}, {pipeline_mode = #tpu.pipeline_mode<synchronous>, transform_indices = @transform_4, window_bounds = array<i64: 2, 1, 512>}, {pipeline_mode = #tpu.pipeline_mode<synchronous>, transform_indices = @transform_5, window_bounds = array<i64: 1024, 128>}, {pipeline_mode = #tpu.pipeline_mode<synchronous>, transform_indices = @transform_6, window_bounds = array<i64: 1, 128>}, {pipeline_mode = #tpu.pipeline_mode<synchronous>, transform_indices = @transform_7, window_bounds = array<i64: 16, 128>}]} {
    %c0_i32 = arith.constant 0 : i32
    %0 = arith.cmpi eq, %arg0, %c0_i32 : i32
    %1 = arith.extui %0 : i1 to i32
    %c0_i32_0 = arith.constant 0 : i32
    %2 = arith.cmpi ne, %1, %c0_i32_0 : i32
    scf.if %2 {
      %c0_10 = arith.constant 0 : index
      %c0_11 = arith.constant 0 : index
      %21 = vector.load %arg1[%c0_10, %c0_11] : memref<16x32xbf16, #tpu.memory_space<vmem>>, vector<16x32xbf16>
      %c0_12 = arith.constant 0 : index
      %c0_13 = arith.constant 0 : index
      %22 = vector.load %arg2[%c0_12, %c0_13] : memref<32x1536xbf16, #tpu.memory_space<vmem>>, vector<32x1536xbf16>
      %cst_14 = arith.constant dense<0.000000e+00> : vector<16x1536xf32>
      %23 = tpu.matmul %21, %22, %cst_14 {dimension_numbers = #tpu.dot_dimension_numbers<[1], [0], [0], [1], [0, 0, 1, 1], [], []>} : vector<16x32xbf16>, vector<32x1536xbf16>, vector<16x1536xf32> -> vector<16x1536xf32>
      %c0_15 = arith.constant 0 : index
      %c0_16 = arith.constant 0 : index
      %24 = vector.load %arg3[%c0_15, %c0_16] : memref<1x1536xf32, #tpu.memory_space<vmem>>, vector<1x1536xf32>
      %25 = vector.broadcast %24 : vector<1x1536xf32> to vector<16x1536xf32>
      %26 = arith.addf %23, %25 : vector<16x1536xf32>
      %cst_17 = arith.constant 0.000000e+00 : f32
      %27 = vector.broadcast %cst_17 : f32 to vector<16x1536xf32>
      %28 = arith.maximumf %26, %27 : vector<16x1536xf32>
      %29 = arith.truncf %28 : vector<16x1536xf32> to vector<16x1536xbf16>
      %c0_18 = arith.constant 0 : index
      %c0_19 = arith.constant 0 : index
      %30 = vector.load %arg9[%c0_18, %c0_19] : memref<16x1536xbf16, #tpu.memory_space<vmem>>, vector<16x1536xbf16>
      tpu.vector_store %arg9[%c0_18, %c0_19], %29 {strides = array<i32>} : memref<16x1536xbf16, #tpu.memory_space<vmem>>, vector<16x1536xbf16>,
    } else {
    }
    %c0 = arith.constant 0 : index
    %c0_1 = arith.constant 0 : index
    %3 = vector.load %arg9[%c0, %c0_1] : memref<16x1536xbf16, #tpu.memory_space<vmem>>, vector<16x1536xbf16>
    %c0_2 = arith.constant 0 : index
    %c0_3 = arith.constant 0 : index
    %4 = vector.load %arg4[%c0_2, %c0_3] : memref<1536x512xbf16, #tpu.memory_space<vmem>>, vector<1536x512xbf16>
    %cst = arith.constant dense<0.000000e+00> : vector<16x512xf32>
    %5 = tpu.matmul %3, %4, %cst {dimension_numbers = #tpu.dot_dimension_numbers<[1], [0], [0], [1], [0, 0, 1, 1], [], []>} : vector<16x1536xbf16>, vector<1536x512xbf16>, vector<16x512xf32> -> vector<16x512xf32>
    %6 = arith.index_cast %arg0 : i32 to index
    %c0_4 = arith.constant 0 : index
    %c0_5 = arith.constant 0 : index
    %7 = vector.load %arg5[%6, %c0_4, %c0_5] : memref<2x1x512xf32, #tpu.memory_space<vmem>>, vector<1x1x512xf32>
    %8 = vector.shape_cast %7 : vector<1x1x512xf32> to vector<1x512xf32>
    %9 = vector.broadcast %8 : vector<1x512xf32> to vector<16x512xf32>
    %10 = arith.addf %5, %9 : vector<16x512xf32>
    %cst_6 = arith.constant 0.000000e+00 : f32
    %11 = vector.broadcast %cst_6 : f32 to vector<16x512xf32>
    %12 = arith.maximumf %10, %11 : vector<16x512xf32>
    %13 = arith.truncf %12 : vector<16x512xf32> to vector<16x512xbf16>
    %14 = arith.index_cast %arg0 : i32 to index
    %c0_7 = arith.constant 0 : index
    %c0_8 = arith.constant 0 : index
    %15 = vector.load %arg10[%14, %c0_7, %c0_8] : memref<2x16x512xbf16, #tpu.memory_space<vmem>>, vector<1x16x512xbf16>
    %16 = vector.shape_cast %15 : vector<1x16x512xbf16> to vector<16x512xbf16>
    %17 = vector.shape_cast %13 : vector<16x512xbf16> to vector<1x16x512xbf16>
    tpu.vector_store %arg10[%14, %c0_7, %c0_8], %17 {strides = array<i32>} : memref<2x16x512xbf16, #tpu.memory_space<vmem>>, vector<1x16x512xbf16>,
    %c1_i32 = arith.constant 1 : i32
    %18 = arith.cmpi eq, %arg0, %c1_i32 : i32
    %19 = arith.extui %18 : i1 to i32
    %c0_i32_9 = arith.constant 0 : i32
    %20 = arith.cmpi ne, %19, %c0_i32_9 : i32
    scf.if %20 {
      %cst_10 = arith.constant 0.000000e+00 : f32
      %21 = vector.broadcast %cst_10 : f32 to vector<16x128xf32>
      %c0_11 = arith.constant 0 : index
      %c0_12 = arith.constant 0 : index
      %c0_13 = arith.constant 0 : index
      %22 = vector.load %arg10[%c0_11, %c0_12, %c0_13] : memref<2x16x512xbf16, #tpu.memory_space<vmem>>, vector<1x16x512xbf16>
      %23 = vector.shape_cast %22 : vector<1x16x512xbf16> to vector<16x512xbf16>
      %c0_14 = arith.constant 0 : index
      %c0_15 = arith.constant 0 : index
      %24 = vector.load %arg6[%c0_14, %c0_15] : memref<1024x128xbf16, #tpu.memory_space<vmem>>, vector<512x128xbf16>
      %cst_16 = arith.constant dense<0.000000e+00> : vector<16x128xf32>
      %25 = tpu.matmul %23, %24, %cst_16 {dimension_numbers = #tpu.dot_dimension_numbers<[1], [0], [0], [1], [0, 0, 1, 1], [], []>} : vector<16x512xbf16>, vector<512x128xbf16>, vector<16x128xf32> -> vector<16x128xf32>
      %26 = arith.addf %21, %25 : vector<16x128xf32>
      %c1 = arith.constant 1 : index
      %c0_17 = arith.constant 0 : index
      %c0_18 = arith.constant 0 : index
      %27 = vector.load %arg10[%c1, %c0_17, %c0_18] : memref<2x16x512xbf16, #tpu.memory_space<vmem>>, vector<1x16x512xbf16>
      %28 = vector.shape_cast %27 : vector<1x16x512xbf16> to vector<16x512xbf16>
      %c512 = arith.constant 512 : index
      %c0_19 = arith.constant 0 : index
      %29 = vector.load %arg6[%c512, %c0_19] : memref<1024x128xbf16, #tpu.memory_space<vmem>>, vector<512x128xbf16>
      %cst_20 = arith.constant dense<0.000000e+00> : vector<16x128xf32>
      %30 = tpu.matmul %28, %29, %cst_20 {dimension_numbers = #tpu.dot_dimension_numbers<[1], [0], [0], [1], [0, 0, 1, 1], [], []>} : vector<16x512xbf16>, vector<512x128xbf16>, vector<16x128xf32> -> vector<16x128xf32>
      %31 = arith.addf %26, %30 : vector<16x128xf32>
      %c0_21 = arith.constant 0 : index
      %c0_22 = arith.constant 0 : index
      %32 = vector.load %arg7[%c0_21, %c0_22] : memref<1x128xf32, #tpu.memory_space<vmem>>, vector<1x128xf32>
      %33 = vector.broadcast %32 : vector<1x128xf32> to vector<16x128xf32>
      %34 = arith.addf %31, %33 : vector<16x128xf32>
      %c0_23 = arith.constant 0 : index
      %c0_24 = arith.constant 0 : index
      %35 = vector.load %arg8[%c0_23, %c0_24] : memref<16x128xf32, #tpu.memory_space<vmem>>, vector<16x128xf32>
      tpu.vector_store %arg8[%c0_23, %c0_24], %34 {strides = array<i32>} : memref<16x128xf32, #tpu.memory_space<vmem>>, vector<16x128xf32>,
    } else {
    }
    return
  }
  func.func @transform_0(%arg0: i32) -> (i32, i32) {
    %c0_i32 = arith.constant 0 : i32
    %c0_i32_0 = arith.constant 0 : i32
    %c0_i32_1 = arith.constant 0 : i32
    return %c0_i32, %c0_i32_0 : i32, i32
  }
  func.func @transform_1(%arg0: i32) -> (i32, i32) {
    %c0_i32 = arith.constant 0 : i32
    %c0_i32_0 = arith.constant 0 : i32
    %c0_i32_1 = arith.constant 0 : i32
    return %c0_i32, %c0_i32_0 : i32, i32
  }
  func.func @transform_2(%arg0: i32) -> (i32, i32) {
    %c0_i32 = arith.constant 0 : i32
    %c0_i32_0 = arith.constant 0 : i32
    %c0_i32_1 = arith.constant 0 : i32
    return %c0_i32, %c0_i32_0 : i32, i32
  }
  func.func @transform_3(%arg0: i32) -> (i32, i32) {
    %c0_i32 = arith.constant 0 : i32
    %c0_i32_0 = arith.constant 0 : i32
    return %c0_i32, %arg0 : i32, i32
  }
  func.func @transform_4(%arg0: i32) -> (i32, i32, i32) {
    %c0_i32 = arith.constant 0 : i32
    %c0_i32_0 = arith.constant 0 : i32
    %c0_i32_1 = arith.constant 0 : i32
    %c0_i32_2 = arith.constant 0 : i32
    return %c0_i32, %c0_i32_0, %c0_i32_1 : i32, i32, i32
  }
  func.func @transform_5(%arg0: i32) -> (i32, i32) {
    %c0_i32 = arith.constant 0 : i32
    %c0_i32_0 = arith.constant 0 : i32
    %c0_i32_1 = arith.constant 0 : i32
    return %c0_i32, %c0_i32_0 : i32, i32
  }
  func.func @transform_6(%arg0: i32) -> (i32, i32) {
    %c0_i32 = arith.constant 0 : i32
    %c0_i32_0 = arith.constant 0 : i32
    %c0_i32_1 = arith.constant 0 : i32
    return %c0_i32, %c0_i32_0 : i32, i32
  }
  func.func @transform_7(%arg0: i32) -> (i32, i32) {
    %c0_i32 = arith.constant 0 : i32
    %c0_i32_0 = arith.constant 0 : i32
    %c0_i32_1 = arith.constant 0 : i32
    return %c0_i32, %c0_i32_0 : i32, i32
  }
}

</mosaic_0001>

<bundles_post_ra>
// kernel: tpu_custom_call.1
= control target key start
LH: loop header
LB: loop body
LE: loop exit
PB: predicated region body
PF: predicated region fallthrough
CT: control target
= control target key end

     0   :  { %12 = vsyncpa [#allocation5], 0  ;;  %s7098_s0 = inlined_call_operand.hbm [shape: bf16[16,32], index: 0, kind: input, shape index: {}]   ;;  %s7099_s1 = inlined_call_operand.hbm [shape: bf16[32,1536], index: 1, kind: input, shape index: {}]   ;;  %s7100_s2 = inlined_call_operand.hbm [shape: f32[1,1536], index: 2, kind: input, shape index: {}]   ;;  %s7101_s3 = inlined_call_operand.hbm [shape: bf16[1536,1024], index: 3, kind: input, shape index: {}]   ;;  %s7102_s4 = inlined_call_operand.hbm [shape: f32[2,1,512], index: 4, kind: input, shape index: {}]   ;;  %s7103_s5 = inlined_call_operand.hbm [shape: bf16[1024,128], index: 5, kind: input, shape index: {}]   ;;  %s7104_s6 = inlined_call_operand.hbm [shape: f32[1,128], index: 6, kind: input, shape index: {}]   ;;  %s7105_s7 = inlined_call_operand.hbm [shape: f32[16,128], index: 7, kind: output, shape index: {}]  }
   0x1   :  { %13 = vsyncpa [#allocation8], 0 }
   0x2   :  { %14 = vsyncpa [#allocation11], 0 }
   0x3   :  { %16 = vsyncpa [#allocation11 + $0x1], 0 }
   0x4   :  { %17 = vsyncpa [#allocation14], 0 }
   0x5   :  { %18 = vsyncpa [#allocation6], 0  ;;  %s6373_s24 = smov 0   ;;  %s6375_s25 = smov 0  }
   0x6   :  { %s6377_s26 = smov 0   ;;  %s6379_s27 = smov 0  }
   0x7 LB: > { %s6315_s28 = smov [#allocation7]   ;;  %s6394_s30 = sadd.s32 4294967295, %s6313_s27   ;;  %s6313_s27 = sphi %s6379_s27, %s7127_s27   ;;  %s6309_s26 = sphi %s6377_s26, %s7126_s26   ;;  %s6305_s25 = sphi %s6375_s25, %s7125_s25   ;;  %s6301_s24 = sphi %s6373_s24, %s7124_s24  }
   0x8   : > { %s227_s29 = sshll.u32 %s6315_s28, 4  ;;  %p4596_p0 = scmp.ge.s32.totalorder %s6313_s27, 1  ;;  %s6400_s29 = int_to_ptr.vmem [resolvable:$true] %s227_s29 }
   0x9   : > { %p7106_p1 = scmp.eq.s32.totalorder %s6394_s30, 0  ;;  %p202_p2 = scmp.lt.s32.totalorder %s6313_s27, 3 }
   0xa   : > { %s6316_s10 = smov [#allocation12]   ;;  %s6317_s12 = smov [#allocation13]  }
   0xb   : > { %p6402_p4 = pnand %p4596_p0, %p202_p2  ;;  %s251_s11 = sshll.u32 %s6316_s10, 4  ;;  %s6414_s11 = int_to_ptr.vmem [resolvable:$true] %s251_s11 }
   0xc   : > { %s6416_s13 = sshll.u32 %s6317_s12, 4  ;;  %s6035_s16 = scalar_lea.hbm %s7099_s1, 3072  ;;  %s265_s13 = int_to_ptr.vmem [resolvable:$true] %s6416_s13 }
   0xd   : > { %s7108_s8 = scalar_select %p6402_p4, 1, 0 }
   0xe   : > { %p5271_p5 = pneg %p6402_p4  ;;  %p6036_p7 = scmp.ne.s32.totalorder %s7099_s1, %s6035_s16 }
   0xf   : > { %p6042_p11 = scmp.lt.u32.totalorder %s6035_s16, %s7099_s1 }
  0x10   : > { %p6410_p6 = pnand %p5271_p5, %p7106_p1 }
  0x12   : > { %p6426_p8 = pneg %p6410_p6 }
  0x14   : > { %p6038_p9 = pnand %p6426_p8, %p6036_p7 }
  0x16   : > { %p6039_p10 = pneg %p6038_p9 }
  0x18   : > { %p6044_p12 = pnand %p6042_p11, %p6039_p10 }
  0x1a   : > { %6047 = shalt.err (!%p6044_p12)
}
  0x1b   : > { %s6048_s22 = scalar_lea.vmem %s6400_s29, 3072  ;;  %p6056_p5 = scmp.lt.s32.totalorder %s6400_s29, %s6400_s29 }
  0x1c   : > { %p6049_p13 = scmp.ne.s32.totalorder %s6400_s29, %s6048_s22  ;;  %p6057_p3 = scmp.lt.s32.totalorder %s6048_s22, %s6048_s22 }
  0x1e   : > { %p6051_p0 = pnand %p6049_p13, %p6426_p8  ;;  %p6058_p7 = por %p6057_p3, %p6056_p5 }
  0x20   : > { %p6052_p2 = pneg %p6051_p0 }
  0x22   : > { %p6059_p9 = pnand %p6058_p7, %p6052_p2 }
  0x24   : > { %6062 = shalt.err (!%p6059_p9)
}
  0x25   : > { %s6318_s23 = smov 768   ;;  %s6319_s28 = smov 48  }
  0x26   : > { %5277 = dma.hbm_to_vmem [thread:$0]  (!%p6410_p6), %s7099_s1, 3072, %s6400_s29, [#allocation8], %s6318_s23, %s6318_s23, %s6319_s28  }
  0x27   : > { %s6063_s16 = scalar_lea.hbm %s7102_s4, 128 }
  0x28   : > { %p6064_p3 = scmp.ne.s32.totalorder %s7102_s4, %s6063_s16  ;;  %p6070_p12 = scmp.lt.u32.totalorder %s6063_s16, %s7102_s4 }
  0x2a   : > { %p6066_p10 = pnand %p6064_p3, %p6426_p8 }
  0x2c   : > { %p6067_p11 = pneg %p6066_p10 }
  0x2e   : > { %p6072_p13 = pnand %p6070_p12, %p6067_p11 }
  0x30   : > { %6075 = shalt.err (!%p6072_p13)
}
  0x31   : > { %s6076_s29 = scalar_lea.vmem %s6414_s11, 128  ;;  %p6084_p7 = scmp.lt.s32.totalorder %s6414_s11, %s6414_s11 }
  0x32   : > { %p6077_p0 = scmp.ne.s32.totalorder %s6414_s11, %s6076_s29  ;;  %p6085_p9 = scmp.lt.s32.totalorder %s6076_s29, %s6076_s29 }
  0x34   : > { %p6079_p2 = pnand %p6077_p0, %p6426_p8  ;;  %p6086_p3 = por %p6085_p9, %p6084_p7 }
  0x36   : > { %p6080_p5 = pneg %p6079_p2 }
  0x38   : > { %p6087_p10 = pnand %p6086_p3, %p6080_p5 }
  0x3a   : > { %6090 = shalt.err (!%p6087_p10)
}
  0x3b   : > { %s6320_s22 = smov 64   ;;  %s6321_s23 = smov 4  }
  0x3c   : > { %5283 = dma.hbm_to_vmem [thread:$0]  (!%p6410_p6), %s7102_s4, 128, %s6414_s11, [#allocation11], %s6320_s22, %s6320_s22, %s6321_s23  }
  0x3d   : > { %s6091_s15 = scalar_lea.hbm %s7103_s5, 8192 }
  0x3e   : > { %p6092_p11 = scmp.ne.s32.totalorder %s7103_s5, %s6091_s15  ;;  %p6098_p0 = scmp.lt.u32.totalorder %s6091_s15, %s7103_s5 }
  0x40   : > { %p6094_p12 = pnand %p6092_p11, %p6426_p8 }
  0x42   : > { %p6095_p13 = pneg %p6094_p12 }
  0x44   : > { %p6100_p2 = pnand %p6098_p0, %p6095_p13 }
  0x46   : > { %6103 = shalt.err (!%p6100_p2)
}
  0x47   : > { %s6104_s21 = scalar_lea.vmem %s265_s13, 8192  ;;  %p6112_p3 = scmp.lt.s32.totalorder %s265_s13, %s265_s13 }
  0x48   : > { %p6105_p5 = scmp.ne.s32.totalorder %s265_s13, %s6104_s21  ;;  %p6113_p10 = scmp.lt.s32.totalorder %s6104_s21, %s6104_s21 }
  0x4a   : > { %p6107_p7 = pnand %p6105_p5, %p6426_p8  ;;  %p6114_p1 = por %p6113_p10, %p6112_p3 }
  0x4c   : > { %p6108_p9 = pneg %p6107_p7 }
  0x4e   : > { %p6115_p4 = pnand %p6114_p1, %p6108_p9 }
  0x50   : > { %6118 = shalt.err (!%p6115_p4)
}
  0x51   : > { %5286 = dma.hbm_to_vmem [thread:$0]  (!%p6410_p6), %s7103_s5, 8192, %s265_s13, [#allocation14], %s6320_s22, %s6320_s22, %s6321_s23  }
  0x52   : > { %s6322_s28 = smov [#allocation4]   ;;  %s6323_s12 = smov [#allocation9]  }
  0x53   : > { %s214_s10 = sshll.u32 %s6322_s28, 4  ;;  %s241_s14 = sshll.u32 %s6323_s12, 4  ;;  %s215_s10 = int_to_ptr.vmem [resolvable:$true] %s214_s10  ;;  %s242_s14 = int_to_ptr.vmem [resolvable:$true] %s241_s14 }
  0x54   : > { %s6119_s17 = scalar_lea.hbm %s7098_s0, 128 }
  0x55   : > { %p6120_p1 = scmp.ne.s32.totalorder %s7098_s0, %s6119_s17  ;;  %p6126_p12 = scmp.lt.u32.totalorder %s6119_s17, %s7098_s0 }
  0x57   : > { %p6122_p4 = pnand %p6120_p1, %p6426_p8 }
  0x59   : > { %p6123_p11 = pneg %p6122_p4 }
  0x5b   : > { %p6128_p13 = pnand %p6126_p12, %p6123_p11 }
  0x5d   : > { %6131 = shalt.err (!%p6128_p13)
}
  0x5e   : > { %s6132_s13 = scalar_lea.vmem %s215_s10, 128  ;;  %p6140_p7 = scmp.lt.s32.totalorder %s215_s10, %s215_s10 }
  0x5f   : > { %p6133_p0 = scmp.ne.s32.totalorder %s215_s10, %s6132_s13  ;;  %p6141_p9 = scmp.lt.s32.totalorder %s6132_s13, %s6132_s13 }
  0x61   : > { %p6135_p2 = pnand %p6133_p0, %p6426_p8  ;;  %p6142_p3 = por %p6141_p9, %p6140_p7 }
  0x63   : > { %p6136_p5 = pneg %p6135_p2 }
  0x65   : > { %p6143_p10 = pnand %p6142_p3, %p6136_p5 }
  0x67   : > { %6146 = shalt.err (!%p6143_p10)
}
  0x68   : > { %5274 = dma.hbm_to_vmem [thread:$0]  (!%p6410_p6), %s7098_s0, 128, %s215_s10, [#allocation5], %s6320_s22, %s6320_s22, %s6321_s23  }
  0x69   : > { %s6147_s16 = scalar_lea.hbm %s7100_s2, 192 }
  0x6a   : > { %p6148_p1 = scmp.ne.s32.totalorder %s7100_s2, %s6147_s16  ;;  %p6154_p12 = scmp.lt.u32.totalorder %s6147_s16, %s7100_s2 }
  0x6c   : > { %p6150_p4 = pnand %p6148_p1, %p6426_p8 }
  0x6e   : > { %p6151_p11 = pneg %p6150_p4 }
  0x70   : > { %p6156_p13 = pnand %p6154_p12, %p6151_p11 }
  0x72   : > { %6159 = shalt.err (!%p6156_p13)
}
  0x73   : > { %s6160_s11 = scalar_lea.vmem %s242_s14, 192  ;;  %p6168_p7 = scmp.lt.s32.totalorder %s242_s14, %s242_s14 }
  0x74   : > { %p6161_p0 = scmp.ne.s32.totalorder %s242_s14, %s6160_s11  ;;  %p6169_p9 = scmp.lt.s32.totalorder %s6160_s11, %s6160_s11 }
  0x76   : > { %p6163_p2 = pnand %p6161_p0, %p6426_p8  ;;  %p6170_p3 = por %p6169_p9, %p6168_p7 }
  0x78   : > { %p6164_p5 = pneg %p6163_p2 }
  0x7a   : > { %p6171_p10 = pnand %p6170_p3, %p6164_p5 }
  0x7c   : > { %6174 = shalt.err (!%p6171_p10)
}
  0x7d   : > { %5280 = dma.hbm_to_vmem [thread:$0]  (!%p6410_p6), %s7100_s2, 192, %s242_s14, [#allocation8]  }
  0x7e   : > { %s6324_s10 = smov [#allocation15]   ;;  %s6175_s12 = scalar_lea.hbm %s7104_s6, 16 }
  0x7f   : > { %s278_s13 = sshll.u32 %s6324_s10, 4  ;;  %p6176_p1 = scmp.ne.s32.totalorder %s7104_s6, %s6175_s12  ;;  %s279_s13 = int_to_ptr.vmem [resolvable:$true] %s278_s13 }
  0x80   : > { %p6182_p12 = scmp.lt.u32.totalorder %s6175_s12, %s7104_s6 }
  0x81   : > { %p6178_p4 = pnand %p6176_p1, %p6426_p8 }
  0x83   : > { %p6179_p11 = pneg %p6178_p4 }
  0x85   : > { %p6184_p13 = pnand %p6182_p12, %p6179_p11 }
  0x87   : > { %6187 = shalt.err (!%p6184_p13)
}
  0x88   : > { %s6188_s14 = scalar_lea.vmem %s279_s13, 16  ;;  %s6195_s20 = scalar_lea.vmem %s279_s13, 32 }
  0x89   : > { %p6189_p0 = scmp.ne.s32.totalorder %s279_s13, %s6188_s14  ;;  %p6196_p7 = scmp.lt.s32.totalorder %s279_s13, %s279_s13 }
  0x8a   : > { %p6197_p9 = scmp.lt.s32.totalorder %s6195_s20, %s6188_s14 }
  0x8b   : > { %p6191_p2 = pnand %p6189_p0, %p6426_p8 }
  0x8c   : > { %p6198_p3 = por %p6197_p9, %p6196_p7 }
  0x8d   : > { %p6192_p5 = pneg %p6191_p2 }
  0x8f   : > { %p6199_p10 = pnand %p6198_p3, %p6192_p5 }
  0x91   : > { %6202 = shalt.err (!%p6199_p10)
}
  0x92   : > { %5289 = dma.hbm_to_vmem [thread:$0]  (!%p6410_p6), %s7104_s6, 16, %s279_s13, [#allocation14]  }
  0x93   : > { %s6553_s19 = sadd.s32 1, %s6313_s27   ;;  %s94_s9 = sadd.s32 1, %s6309_s26 }
  0x94   : > { %s91_s22 = ssub.s32 %s6313_s27, %s6553_s19  ;;  %p101_p8 = scmp.ne.s32.totalorder %s6309_s26, %s6305_s25 }
  0x95   : > { %p92_p1 = scmp.eq.s32.totalorder %s91_s22, 0  ;;  %p102_p4 = scmp.eq.s32.totalorder %s6313_s27, 0 }
  0x96   : > { %p107_p11 = scmp.ne.s32.totalorder %s6305_s25, %s6301_s24  ;;  %p5300_p12 = scmp.lt.s32.totalorder %s6313_s27, 2 }
  0x97   : > { %s6565_s23 = scalar_select %p92_p1, %s6309_s26, %s94_s9  }
  0x98   : > { %p103_p13 = por %p102_p4, %p101_p8  ;;  %p7111_p0 = scmp.eq.s32.totalorder %s6394_s30, 0 }
  0x99   : > { %s289_s29 = sand.u32 1, %s6313_s27   ;;  %s291_s13 = sand.u32 1, %s6309_s26  }
  0x9a   : > { %p6569_p2 = por %p7111_p0, %p107_p11  ;;  %s5239_s28 = smul.u32 3072, %s291_s13 }
  0x9b   : > { %s5101_s12 = sshll.u32 %s6313_s27, 8  ;;  %p6576_p6 = pnand %p5300_p12, %p103_p13 }
  0x9c   : > { %s6583_s24 = scalar_lea.hbm %s7101_s3, %s5101_s12  ;;  %s293_s18 = scalar_lea.vmem [#allocation10], %s5239_s28 }
  0x9d   : > { %s300_s14 = sshll.u32 %s293_s18, 4  ;;  %s6587_s27 = scalar_lea.sflag [#allocation11], %s289_s29  ;;  %s6585_s14 = int_to_ptr.vmem [resolvable:$true] %s300_s14 }
  0x9e   : > { %s6203_s20 = scalar_lea.hbm %s6583_s24, 49152  ;;  %p6205_p7 = pneg %p6576_p6 }
  0x9f   : > { %p6204_p5 = scmp.ne.s32.totalorder %s6583_s24, %s6203_s20  ;;  %s6208_s9 = scalar_lea.hbm %s7101_s3, 98304 }
  0xa0   : > { %p6209_p10 = scmp.lt.u32.totalorder %s6583_s24, %s7101_s3  ;;  %p6210_p8 = scmp.lt.u32.totalorder %s6208_s9, %s6203_s20 }
  0xa1   : > { %p6206_p9 = pnand %p6205_p7, %p6204_p5  ;;  %p6212_p4 = scmp.lt.u32.totalorder %s6203_s20, %s6583_s24 }
  0xa2   : > { %p6211_p1 = por %p6210_p8, %p6209_p10 }
  0xa3   : > { %p6207_p3 = pneg %p6206_p9 }
  0xa4   : > { %p6213_p11 = por %p6212_p4, %p6211_p1 }
  0xa6   : > { %p6214_p12 = pnand %p6213_p11, %p6207_p3 }
  0xa8   : > { %6217 = shalt.err (!%p6214_p12)
}
  0xa9   : > { %s6218_s29 = scalar_lea.vmem %s6585_s14, 49152  ;;  %s6325_s28 = smov [#allocation10]  }
  0xaa   : > { %p6219_p13 = scmp.ne.s32.totalorder %s6585_s14, %s6218_s29  ;;  %s6223_s12 = sshll.u32 %s6325_s28, 4  ;;  %s6224_s12 = int_to_ptr.vmem [resolvable:$false] %s6223_s12 }
  0xab   : > { %s6225_s16 = scalar_lea.vmem %s6224_s12, 98304  ;;  %p6226_p9 = scmp.lt.s32.totalorder %s6585_s14, %s6224_s12 }
  0xac   : > { %p6221_p0 = pnand %p6219_p13, %p6205_p7  ;;  %p6227_p10 = scmp.lt.s32.totalorder %s6225_s16, %s6218_s29 }
  0xae   : > { %p6222_p5 = pneg %p6221_p0  ;;  %p6228_p8 = por %p6227_p10, %p6226_p9 }
  0xb0   : > { %p6229_p1 = pnand %p6228_p8, %p6222_p5 }
  0xb2   : > { %6232 = shalt.err (!%p6229_p1)
}
  0xb3   : > { %s6326_s17 = smov 512   ;;  %s6327_s18 = smov 256  }
  0xb4   : > { %s6328_s20 = smov 16   ;;  %p7114_p7 = scmp.ne.s32.totalorder %s7108_s8, 0 }
  0xb5   : > { %5293 = dma.hbm_to_vmem [thread:$0]  (!%p6576_p6), %s6583_s24, 49152, %s6585_s14, %s6587_s27, %s6326_s17, %s6327_s18, %s6328_s20  }
  0xb6   : > { %312 = sbr.rel (%p7114_p7) target bundleno = 1350 (0x546), region = 48  ;;  %p7115_p3 = scmp.eq.s32.totalorder (!%p7114_p7), %s6394_s30, 0 }
  0xbd   : > { %6276 = dma.done.wait (%p7115_p3), [#allocation5], 128   ;;  %p7116_p4 = pmov %p7115_p3 }
  0xbe   : > { %p7117_p11 = pmov %p7115_p3 }
  0xbf   : > { %6278 = vsyncadd (%p7116_p4), [#allocation5], 4294967168 }
  0xc0   : > { %6280 = dma.done.wait (%p7117_p11), [#allocation8], 3264   ;;  %p7118_p12 = pmov %p7115_p3 }
  0xc1   : > { %s326_s15 = sand.u32 1, %s6394_s30   ;;  %s328_s24 = sand.u32 1, %s6305_s25  }
  0xc2   : > { %6282 = vsyncadd (%p7118_p12), [#allocation8], 4294964032  ;;  %s5240_s14 = smul.u32 3072, %s328_s24  ;;  %s327_s8 = scalar_lea.sflag [#allocation11], %s326_s15 }
  0xc4   : > { %s6627_s27 = scalar_lea.vmem [#allocation10], %s5240_s14 }
  0xc5   : > { %6284 = dma.done.wait (%p6569_p2), %s327_s8, 49152  }
  0xc6   : > { %6286 = vsyncadd (%p6569_p2), %s327_s8, 4294918144  ;;  %p7119_p6 = pmov %p7115_p3 }
  0xc7   : > { %p7120_p13 = pmov %p7115_p3 }
  0xc8   : > { %6288 = dma.done.wait (%p7119_p6), [#allocation11], 128  }
  0xc9   : > { %6290 = vsyncadd (%p7120_p13), [#allocation11], 4294967168  ;;  %p7121_p0 = pmov %p7115_p3 }
  0xcb   : > { %6292 = dma.done.wait (%p7121_p0), [#allocation14], 8208   ;;  %p7122_p5 = pmov %p7121_p0 }
  0xcc   : > { %p7123_p9 = scmp.ne.s32.totalorder %s6394_s30, 0 }
  0xcd   : > { %6294 = vsyncadd (%p7122_p5), [#allocation14], 4294959088  ;;  %v5358_v0 = vld [vmem:[#allocation7 + $0x4] ss:$48 sps:$4 sm:$0xff] (!%p7123_p9)   ;;  %v5360_v1 = vld [vmem:[#allocation7 + $0xc] ss:$48 sps:$4 sm:$0xff] (!%p7123_p9)   ;;  %v404_v26 = vlaneseq (!%p7123_p9) }
  0xce   : > { %373 = sbr.rel (%p7123_p9) target bundleno = 453 (0x1c5), region = 80  ;;  %v6329_v2 = vmov (!%p7123_p9), 0   ;;  %593 = vmatprep.subr.bf16.mxu0 (!%p7123_p9), %v5358_v0  ;;  %v5362_v3 = vld [vmem:[#allocation7] ss:$48 sps:$4 sm:$0xff] (!%p7123_p9)   ;;  %v5363_v4 = vld [vmem:[#allocation7 + $0x8] ss:$48 sps:$4 sm:$0xff] (!%p7123_p9)   ;;  %636 = vmatprep.subr.bf16.mxu1 (!%p7123_p9), %v5360_v1 }
  0xcf   : > { %625 = vmatprep.mubr.bf16.mxu0 (!%p7123_p9), %v6329_v2  ;;  %668 = vmatprep.mubr.bf16.mxu1 (!%p7123_p9), %v6329_v2  ;;  %v5364_v5 = vld [vmem:[#allocation7 + $0x64] ss:$48 sps:$4 sm:$0xff] (!%p7123_p9)   ;;  %v5366_v6 = vld [vmem:[#allocation7 + $0x6c] ss:$48 sps:$4 sm:$0xff] (!%p7123_p9)   ;;  %v5368_v7 = vld [vmem:[#allocation7 + $0x60] ss:$48 sps:$4 sm:$0xff] (!%p7123_p9)  }
  0xd0   : > { %594 = vmatpush1.bf16.msra.mxu0 (!%p7123_p9), %v5362_v3  ;;  %637 = vmatpush1.bf16.msra.mxu1 (!%p7123_p9), %v5363_v4  ;;  %v5369_v8 = vld [vmem:[#allocation7 + $0x68] ss:$48 sps:$4 sm:$0xff] (!%p7123_p9)   ;;  %v5371_v10 = vld [vmem:[#allocation7 + $0x10] ss:$48 sps:$4 sm:$0xff] (!%p7123_p9)   ;;  %v5373_v11 = vld [vmem:[#allocation7 + $0x14] ss:$48 sps:$4 sm:$0xff] (!%p7123_p9)  }
  0xd1   : > { %595 = vmatprep.subr.bf16.mxu0 (!%p7123_p9), %v5364_v5  ;;  %638 = vmatprep.subr.bf16.mxu1 (!%p7123_p9), %v5366_v6  ;;  %v5370_v9 = vld [vmem:[#allocation4] sm:$0xff] (!%p7123_p9)   ;;  %vm589_vm0 = vcmask (!%p7123_p9), 261120   ;;  %v5379_v14 = vld [vmem:[#allocation7 + $0x74] ss:$48 sps:$4 sm:$0xff] (!%p7123_p9)   ;;  %v5377_v16 = vld [vmem:[#allocation7 + $0x70] ss:$48 sps:$4 sm:$0xff] (!%p7123_p9)  }
  0xd2   : > { %v5374_v12 = vld [vmem:[#allocation7 + $0x18] ss:$48 sps:$4 sm:$0xff] (!%p7123_p9)   ;;  %v5376_v13 = vld [vmem:[#allocation7 + $0x1c] ss:$48 sps:$4 sm:$0xff] (!%p7123_p9)   ;;  %v5385_v18 = vld [vmem:[#allocation7 + $0x24] ss:$48 sps:$4 sm:$0xff] (!%p7123_p9)  }
  0xd3   : > { %v5382_v15 = vld [vmem:[#allocation7 + $0x7c] ss:$48 sps:$4 sm:$0xff] (!%p7123_p9)   ;;  %v5380_v17 = vld [vmem:[#allocation7 + $0x78] ss:$48 sps:$4 sm:$0xff] (!%p7123_p9)   ;;  %v5383_v20 = vld [vmem:[#allocation7 + $0x20] ss:$48 sps:$4 sm:$0xff] (!%p7123_p9)  }
  0xd4   : > { %596 = vmatpush1.bf16.msra.mxu0 (!%p7123_p9), %v5368_v7  ;;  %639 = vmatpush1.bf16.msra.mxu1 (!%p7123_p9), %v5369_v8  ;;  %v5388_v19 = vld [vmem:[#allocation7 + $0x2c] ss:$48 sps:$4 sm:$0xff] (!%p7123_p9)   ;;  %v5386_v21 = vld [vmem:[#allocation7 + $0x28] ss:$48 sps:$4 sm:$0xff] (!%p7123_p9)   ;;  %v5391_v22 = vld [vmem:[#allocation7 + $0x84] ss:$48 sps:$4 sm:$0xff] (!%p7123_p9)  }
  0xd5   : > { %679 = vmatprep.subr.bf16.mxu0 %v5373_v11  ;;  %722 = vmatprep.subr.bf16.mxu1 %v5376_v13  ;;  %v5394_v23 = vld [vmem:[#allocation7 + $0x8c] ss:$48 sps:$4 sm:$0xff]   ;;  %v5389_v24 = vld [vmem:[#allocation7 + $0x80] ss:$48 sps:$4 sm:$0xff]   ;;  %v5392_v25 = vld [vmem:[#allocation7 + $0x88] ss:$48 sps:$4 sm:$0xff]  }
  0xd6   : > { %v6649_v27 = vshrl.u32 %v404_v26, 7  ;;  %v400_v30 = vld [vmem:[#allocation9] sm:$0xff]  ;;  %v401_v11 = vld [vmem:[#allocation9 + $0x8] sm:$0xf] }
  0xd7   : > { %4639 = vmatmul.mubr.msk.bf16.vlgmr.msra.gmra.mrb[0].mxu0 %vm589_vm0, %v5370_v9  ;;  %4640 = vmatmul.mubr.msk.bf16.vlgmr.msra.gmra.mrb[0].mxu1 %vm589_vm0, %v5370_v9 }
  0xd8   : > { %680 = vmatpush1.bf16.msra.mxu0 %v5371_v10  ;;  %723 = vmatpush1.bf16.msra.mxu1 %v5374_v12  ;;  %v406_v28 = vsub.s32 0, %v6649_v27  ;;  %v414_v29 = vsub.s32 2, %v6649_v27  ;;  %v410_v31 = vsub.s32 1, %v6649_v27  ;;  %v418_v32 = vsub.s32 3, %v6649_v27 }
  0xd9   : > { %681 = vmatprep.subr.bf16.mxu0 %v5379_v14  ;;  %724 = vmatprep.subr.bf16.mxu1 %v5382_v15  ;;  %v422_v37 = vsub.s32 4, %v6649_v27  ;;  %v430_v38 = vsub.s32 6, %v6649_v27  ;;  %v426_v41 = vsub.s32 5, %v6649_v27  ;;  %v434_v42 = vsub.s32 7, %v6649_v27 }
  0xda   : > { %711 = vmatprep.mubr.bf16.mxu0 %v6329_v2  ;;  %754 = vmatprep.mubr.bf16.mxu1 %v6329_v2  ;;  %v407_v33 = vrot.slane %v400_v30, %v406_v28  ;;  %v415_v34 = vrot.slane %v400_v30, %v414_v29  ;;  %v411_v35 = vrot.slane %v400_v30, %v410_v31 }
  0xdb   : > { %v419_v36 = vrot.slane %v400_v30, %v418_v32  ;;  %v423_v55 = vrot.slane %v400_v30, %v422_v37  ;;  %v431_v56 = vrot.slane %v400_v30, %v430_v38  ;;  %v427_v59 = vrot.slane %v400_v30, %v426_v41 }
  0xdc   : > { %682 = vmatpush1.bf16.msra.mxu0 %v5377_v16  ;;  %725 = vmatpush1.bf16.msra.mxu1 %v5380_v17  ;;  %v435_v60 = vrot.slane %v400_v30, %v434_v42 }
  0xdd   : > { %765 = vmatprep.subr.bf16.mxu0 %v5385_v18  ;;  %808 = vmatprep.subr.bf16.mxu1 %v5388_v19 }
  0xdf   : > { %4641 = vmatmul.mubr.msk.bf16.vlgmr.msra.gmra.mrb[4].mxu0 %vm589_vm0, %v5370_v9  ;;  %4642 = vmatmul.mubr.msk.bf16.vlgmr.msra.gmra.mrb[4].mxu1 %vm589_vm0, %v5370_v9 }
  0xe0   : > { %766 = vmatpush1.bf16.msra.mxu0 %v5383_v20  ;;  %809 = vmatpush1.bf16.msra.mxu1 %v5386_v21 }
  0xe1   : > { %767 = vmatprep.subr.bf16.mxu0 %v5391_v22  ;;  %810 = vmatprep.subr.bf16.mxu1 %v5394_v23 }
  0xe2   : > { %797 = vmatprep.mubr.bf16.mxu0 %v6329_v2  ;;  %840 = vmatprep.mubr.bf16.mxu1 %v6329_v2 }
  0xe4   : > { %768 = vmatpush1.bf16.msra.mxu0 %v5389_v24  ;;  %811 = vmatpush1.bf16.msra.mxu1 %v5392_v25  ;;  %v439_v24 = vrot.slane %v401_v11, %v406_v28  ;;  %v447_v25 = vrot.slane %v401_v11, %v414_v29 }
  0xe7   : > { %4643 = vmatmul.mubr.msk.bf16.vlgmr.msra.gmra.mrb[8].mxu0 %vm589_vm0, %v5370_v9  ;;  %4644 = vmatmul.mubr.msk.bf16.vlgmr.msra.gmra.mrb[8].mxu1 %vm589_vm0, %v5370_v9 }
 0x1aa   : > { %v627_v39 = vpop.f32.mrb[0].mxu0  ;;  %v670_v40 = vpop.f32.mrb[0].mxu1 }
 0x1ab   : > { %v628_v43 = vadd.f32 %v627_v39, %v407_v33  ;;  %v671_v44 = vadd.f32 %v670_v40, %v415_v34  ;;  %v629_v45 = vpop.f32.mrb[1].mxu0  ;;  %v672_v46 = vpop.f32.mrb[1].mxu1 }
 0x1ac   : > { %v630_v47 = vadd.f32 %v629_v45, %v411_v35  ;;  %v673_v48 = vadd.f32 %v672_v46, %v419_v36  ;;  %v631_v49 = vpop.f32.mrb[2].mxu0  ;;  %v674_v50 = vpop.f32.mrb[2].mxu1 }
 0x1ad   : > { %v632_v51 = vadd.f32 %v631_v49, %v407_v33  ;;  %v675_v52 = vadd.f32 %v674_v50, %v415_v34  ;;  %v633_v53 = vpop.f32.mrb[3].mxu0  ;;  %v676_v54 = vpop.f32.mrb[3].mxu1  ;;  %v851_v61 = vmax.f32 %v628_v43, 0.0  ;;  %v853_v62 = vmax.f32 %v671_v44, 0.0 }
 0x1ae   : > { %v634_v57 = vadd.f32 %v633_v53, %v411_v35  ;;  %v677_v58 = vadd.f32 %v676_v54, %v419_v36  ;;  %v852_v1 = vmax.f32 %v630_v47, 0.0  ;;  %v854_v2 = vmax.f32 %v673_v48, 0.0 }
 0x1af   : > { %v863_v63 = vmax.f32 %v632_v51, 0.0  ;;  %v865_v0 = vmax.f32 %v675_v52, 0.0  ;;  %v443_v33 = vrot.slane %v401_v11, %v410_v31  ;;  %v451_v34 = vrot.slane %v401_v11, %v418_v32 }
 0x1b0   : > { %v864_v3 = vmax.f32 %v634_v57, 0.0  ;;  %v866_v4 = vmax.f32 %v677_v58, 0.0 }
 0x1b1   : > { %v875_v5 = vpack.c.bf16 %v863_v63, %v851_v61  ;;  %v877_v6 = vpack.c.bf16 %v865_v0, %v853_v62 }
 0x1b2   : > { %v876_v7 = vpack.c.bf16 %v864_v3, %v852_v1  ;;  %v878_v8 = vpack.c.bf16 %v866_v4, %v854_v2  ;;  %v713_v9 = vpop.f32.mrb[4].mxu0  ;;  %v756_v10 = vpop.f32.mrb[4].mxu1 }
 0x1b3   : > { %887 = vst [vmem:[#allocation2] sm:$0xff] %v875_v5  ;;  %889 = vst [vmem:[#allocation2 + $0x10] sm:$0xff] %v877_v6  ;;  %v714_v12 = vadd.f32 %v713_v9, %v423_v55  ;;  %v757_v13 = vadd.f32 %v756_v10, %v431_v56  ;;  %v715_v14 = vpop.f32.mrb[5].mxu0  ;;  %v758_v15 = vpop.f32.mrb[5].mxu1 }
 0x1b4   : > { %888 = vst [vmem:[#allocation2 + $0x8] sm:$0xff] %v876_v7  ;;  %890 = vst [vmem:[#allocation2 + $0x18] sm:$0xff] %v878_v8  ;;  %v716_v16 = vadd.f32 %v715_v14, %v427_v59  ;;  %v759_v17 = vadd.f32 %v758_v15, %v435_v60  ;;  %v717_v18 = vpop.f32.mrb[6].mxu0  ;;  %v760_v19 = vpop.f32.mrb[6].mxu1 }
 0x1b5   : > { %v718_v20 = vadd.f32 %v717_v18, %v423_v55  ;;  %v761_v21 = vadd.f32 %v760_v19, %v431_v56  ;;  %v719_v22 = vpop.f32.mrb[7].mxu0  ;;  %v762_v23 = vpop.f32.mrb[7].mxu1  ;;  %v855_v35 = vmax.f32 %v714_v12, 0.0  ;;  %v857_v36 = vmax.f32 %v757_v13, 0.0 }
 0x1b6   : > { %v720_v26 = vadd.f32 %v719_v22, %v427_v59  ;;  %v763_v30 = vadd.f32 %v762_v23, %v435_v60  ;;  %v856_v39 = vmax.f32 %v716_v16, 0.0  ;;  %v858_v40 = vmax.f32 %v759_v17, 0.0 }
 0x1b7   : > { %v867_v37 = vmax.f32 %v718_v20, 0.0  ;;  %v869_v38 = vmax.f32 %v761_v21, 0.0 }
 0x1b8   : > { %v868_v41 = vmax.f32 %v720_v26, 0.0  ;;  %v870_v42 = vmax.f32 %v763_v30, 0.0 }
 0x1b9   : > { %v879_v28 = vpack.c.bf16 %v867_v37, %v855_v35  ;;  %v881_v43 = vpack.c.bf16 %v869_v38, %v857_v36 }
 0x1ba   : > { %v880_v44 = vpack.c.bf16 %v868_v41, %v856_v39  ;;  %v882_v29 = vpack.c.bf16 %v870_v42, %v858_v40  ;;  %v799_v45 = vpop.f32.mrb[8].mxu0  ;;  %v842_v46 = vpop.f32.mrb[8].mxu1 }
 0x1bb   : > { %891 = vst [vmem:[#allocation2 + $0x20] sm:$0xff] %v879_v28  ;;  %893 = vst [vmem:[#allocation2 + $0x30] sm:$0xff] %v881_v43  ;;  %v800_v31 = vadd.f32 %v799_v45, %v439_v24  ;;  %v843_v47 = vadd.f32 %v842_v46, %v447_v25  ;;  %v801_v27 = vpop.f32.mrb[9].mxu0  ;;  %v844_v32 = vpop.f32.mrb[9].mxu1 }
 0x1bc   : > { %892 = vst [vmem:[#allocation2 + $0x28] sm:$0xff] %v880_v44  ;;  %894 = vst [vmem:[#allocation2 + $0x38] sm:$0xff] %v882_v29  ;;  %v802_v48 = vadd.f32 %v801_v27, %v443_v33  ;;  %v845_v49 = vadd.f32 %v844_v32, %v451_v34  ;;  %v803_v50 = vpop.f32.mrb[10].mxu0  ;;  %v846_v51 = vpop.f32.mrb[10].mxu1 }
 0x1bd   : > { %v804_v52 = vadd.f32 %v803_v50, %v439_v24  ;;  %v847_v53 = vadd.f32 %v846_v51, %v447_v25  ;;  %v805_v54 = vpop.f32.mrb[11].mxu0  ;;  %v848_v55 = vpop.f32.mrb[11].mxu1  ;;  %v859_v58 = vmax.f32 %v800_v31, 0.0  ;;  %v861_v59 = vmax.f32 %v843_v47, 0.0 }
 0x1be   : > { %v806_v56 = vadd.f32 %v805_v54, %v443_v33  ;;  %v849_v57 = vadd.f32 %v848_v55, %v451_v34  ;;  %v860_v62 = vmax.f32 %v802_v48, 0.0  ;;  %v862_v63 = vmax.f32 %v845_v49, 0.0 }
 0x1bf   : > { %v871_v60 = vmax.f32 %v804_v52, 0.0  ;;  %v873_v61 = vmax.f32 %v847_v53, 0.0 }
 0x1c0   : > { %v872_v0 = vmax.f32 %v806_v56, 0.0  ;;  %v874_v1 = vmax.f32 %v849_v57, 0.0 }
 0x1c1   : > { %v883_v2 = vpack.c.bf16 %v871_v60, %v859_v58  ;;  %v885_v3 = vpack.c.bf16 %v873_v61, %v861_v59 }
 0x1c2   : > { %v884_v4 = vpack.c.bf16 %v872_v0, %v860_v62  ;;  %v886_v5 = vpack.c.bf16 %v874_v1, %v862_v63 }
 0x1c3   : > { %895 = vst [vmem:[#allocation2 + $0x40] sm:$0xff] %v883_v2  ;;  %897 = vst [vmem:[#allocation2 + $0x50] sm:$0xff] %v885_v3 }
 0x1c4   : > { %896 = vst [vmem:[#allocation2 + $0x48] sm:$0xff] %v884_v4  ;;  %898 = vst [vmem:[#allocation2 + $0x58] sm:$0xff] %v886_v5 }
 0x1c5 PF: > { %v5395_v6 = vld [vmem:[%s6627_s27 + $0x4] ss:$16 sps:$4 sm:$0xff]   ;;  %v5397_v7 = vld [vmem:[%s6627_s27 + $0xc] ss:$16 sps:$4 sm:$0xff]   ;;  %v5399_v8 = vld [vmem:[%s6627_s27] ss:$16 sps:$4 sm:$0xff]  }
 0x1c6   : > { %3239 = vmatprep.subr.bf16.mxu0 %v5395_v6  ;;  %v5400_v9 = vld [vmem:[%s6627_s27 + $0x8] ss:$16 sps:$4 sm:$0xff]   ;;  %3497 = vmatprep.subr.bf16.mxu1 %v5397_v7  ;;  %v5401_v10 = vld [vmem:[%s6627_s27 + $0x24] ss:$16 sps:$4 sm:$0xff]   ;;  %v5403_v11 = vld [vmem:[%s6627_s27 + $0x2c] ss:$16 sps:$4 sm:$0xff]  }
 0x1c7   : > { %3240 = vmatpush1.bf16.msra.mxu0 %v5399_v8  ;;  %3498 = vmatpush1.bf16.msra.mxu1 %v5400_v9  ;;  %v5405_v12 = vld [vmem:[%s6627_s27 + $0x20] ss:$16 sps:$4 sm:$0xff]   ;;  %v5406_v13 = vld [vmem:[%s6627_s27 + $0x28] ss:$16 sps:$4 sm:$0xff]   ;;  %v5407_v14 = vld [vmem:[%s6627_s27 + $0x44] ss:$16 sps:$4 sm:$0xff]  }
 0x1c8   : > { %3241 = vmatprep.subr.bf16.mxu0 %v5401_v10  ;;  %3499 = vmatprep.subr.bf16.mxu1 %v5403_v11  ;;  %v5409_v15 = vld [vmem:[%s6627_s27 + $0x4c] ss:$16 sps:$4 sm:$0xff]   ;;  %v5411_v16 = vld [vmem:[%s6627_s27 + $0x40] ss:$16 sps:$4 sm:$0xff]   ;;  %v5412_v17 = vld [vmem:[%s6627_s27 + $0x48] ss:$16 sps:$4 sm:$0xff]  }
 0x1c9   : > { %v5413_v18 = vld [vmem:[%s6627_s27 + $0x64] ss:$16 sps:$4 sm:$0xff]   ;;  %v5415_v19 = vld [vmem:[%s6627_s27 + $0x6c] ss:$16 sps:$4 sm:$0xff]   ;;  %v5417_v20 = vld [vmem:[%s6627_s27 + $0x60] ss:$16 sps:$4 sm:$0xff]  }
 0x1ca   : > { %v5418_v21 = vld [vmem:[%s6627_s27 + $0x68] ss:$16 sps:$4 sm:$0xff]   ;;  %v5419_v22 = vld [vmem:[%s6627_s27 + $0x84] ss:$16 sps:$4 sm:$0xff]   ;;  %v5421_v23 = vld [vmem:[%s6627_s27 + $0x8c] ss:$16 sps:$4 sm:$0xff]  }
 0x1cb   : > { %3242 = vmatpush1.bf16.msra.mxu0 %v5405_v12  ;;  %3500 = vmatpush1.bf16.msra.mxu1 %v5406_v13  ;;  %v5423_v24 = vld [vmem:[%s6627_s27 + $0x80] ss:$16 sps:$4 sm:$0xff]   ;;  %v5424_v25 = vld [vmem:[%s6627_s27 + $0x88] ss:$16 sps:$4 sm:$0xff]   ;;  %v5425_v26 = vld [vmem:[%s6627_s27 + $0xa4] ss:$16 sps:$4 sm:$0xff]  }
 0x1cc   : > { %3243 = vmatprep.subr.bf16.mxu0 %v5407_v14  ;;  %3501 = vmatprep.subr.bf16.mxu1 %v5409_v15  ;;  %v5427_v30 = vld [vmem:[%s6627_s27 + $0xac] ss:$16 sps:$4 sm:$0xff]   ;;  %v5429_v33 = vld [vmem:[%s6627_s27 + $0xa0] ss:$16 sps:$4 sm:$0xff]   ;;  %v5430_v34 = vld [vmem:[%s6627_s27 + $0xa8] ss:$16 sps:$4 sm:$0xff]  }
 0x1cd   : > { %v5431_v35 = vld [vmem:[%s6627_s27 + $0xc4] ss:$16 sps:$4 sm:$0xff]   ;;  %v5433_v36 = vld [vmem:[%s6627_s27 + $0xcc] ss:$16 sps:$4 sm:$0xff]   ;;  %v5435_v37 = vld [vmem:[%s6627_s27 + $0xc0] ss:$16 sps:$4 sm:$0xff]  }
 0x1ce   : > { %v5436_v38 = vld [vmem:[%s6627_s27 + $0xc8] ss:$16 sps:$4 sm:$0xff]   ;;  %v5437_v39 = vld [vmem:[%s6627_s27 + $0xe4] ss:$16 sps:$4 sm:$0xff]   ;;  %v5439_v40 = vld [vmem:[%s6627_s27 + $0xec] ss:$16 sps:$4 sm:$0xff]  }
 0x1cf   : > { %3244 = vmatpush1.bf16.msra.mxu0 %v5411_v16  ;;  %3502 = vmatpush1.bf16.msra.mxu1 %v5412_v17  ;;  %v5441_v41 = vld [vmem:[%s6627_s27 + $0xe0] ss:$16 sps:$4 sm:$0xff]   ;;  %v5442_v42 = vld [vmem:[%s6627_s27 + $0xe8] ss:$16 sps:$4 sm:$0xff]   ;;  %v5443_v28 = vld [vmem:[%s6627_s27 + $0x104] ss:$16 sps:$4 sm:$0xff]  }
 0x1d0   : > { %3245 = vmatprep.subr.bf16.mxu0 %v5413_v18  ;;  %3503 = vmatprep.subr.bf16.mxu1 %v5415_v19  ;;  %v5445_v43 = vld [vmem:[%s6627_s27 + $0x10c] ss:$16 sps:$4 sm:$0xff]   ;;  %v5447_v44 = vld [vmem:[%s6627_s27 + $0x100] ss:$16 sps:$4 sm:$0xff]   ;;  %v5448_v29 = vld [vmem:[%s6627_s27 + $0x108] ss:$16 sps:$4 sm:$0xff]  }
 0x1d1   : > { %v5449_v45 = vld [vmem:[%s6627_s27 + $0x124] ss:$16 sps:$4 sm:$0xff]   ;;  %v5451_v46 = vld [vmem:[%s6627_s27 + $0x12c] ss:$16 sps:$4 sm:$0xff]   ;;  %v5453_v31 = vld [vmem:[%s6627_s27 + $0x120] ss:$16 sps:$4 sm:$0xff]  }
 0x1d2   : > { %v5454_v47 = vld [vmem:[%s6627_s27 + $0x128] ss:$16 sps:$4 sm:$0xff]   ;;  %v5455_v27 = vld [vmem:[%s6627_s27 + $0x144] ss:$16 sps:$4 sm:$0xff]   ;;  %v5457_v32 = vld [vmem:[%s6627_s27 + $0x14c] ss:$16 sps:$4 sm:$0xff]  }
 0x1d3   : > { %3246 = vmatpush1.bf16.msra.mxu0 %v5417_v20  ;;  %3504 = vmatpush1.bf16.msra.mxu1 %v5418_v21  ;;  %v5459_v48 = vld [vmem:[%s6627_s27 + $0x140] ss:$16 sps:$4 sm:$0xff]   ;;  %v5460_v49 = vld [vmem:[%s6627_s27 + $0x148] ss:$16 sps:$4 sm:$0xff]   ;;  %v5461_v50 = vld [vmem:[%s6627_s27 + $0x164] ss:$16 sps:$4 sm:$0xff]  }
 0x1d4   : > { %3247 = vmatprep.subr.bf16.mxu0 %v5419_v22  ;;  %3505 = vmatprep.subr.bf16.mxu1 %v5421_v23  ;;  %v5463_v51 = vld [vmem:[%s6627_s27 + $0x16c] ss:$16 sps:$4 sm:$0xff]   ;;  %v900_v52 = vld [vmem:[#allocation2 + $0x8] sm:$0xff]  ;;  %v5465_v53 = vld [vmem:[%s6627_s27 + $0x160] ss:$16 sps:$4 sm:$0xff]   ;;  %s4645_s10 = sshll.u32 %s6394_s30, 2 }
 0x1d5   : > { %3271 = vmatprep.mubr.bf16.mxu0 %v900_v52  ;;  %3529 = vmatprep.mubr.bf16.mxu1 %v900_v52  ;;  %v5466_v54 = vld [vmem:[%s6627_s27 + $0x168] ss:$16 sps:$4 sm:$0xff]   ;;  %v5467_v55 = vld [vmem:[%s6627_s27 + $0x184] ss:$16 sps:$4 sm:$0xff]   ;;  %v5469_v56 = vld [vmem:[%s6627_s27 + $0x18c] ss:$16 sps:$4 sm:$0xff]  }
 0x1d6   : > { %v5471_v57 = vld [vmem:[%s6627_s27 + $0x180] ss:$16 sps:$4 sm:$0xff]   ;;  %v5472_v58 = vld [vmem:[%s6627_s27 + $0x188] ss:$16 sps:$4 sm:$0xff]   ;;  %v5473_v59 = vld [vmem:[%s6627_s27 + $0x1a4] ss:$16 sps:$4 sm:$0xff]  }
 0x1d7   : > { %3248 = vmatpush1.bf16.msra.mxu0 %v5423_v24  ;;  %3506 = vmatpush1.bf16.msra.mxu1 %v5424_v25  ;;  %v5475_v60 = vld [vmem:[%s6627_s27 + $0x1ac] ss:$16 sps:$4 sm:$0xff]   ;;  %v5477_v61 = vld [vmem:[%s6627_s27 + $0x1a0] ss:$16 sps:$4 sm:$0xff]   ;;  %v5478_v62 = vld [vmem:[%s6627_s27 + $0x1a8] ss:$16 sps:$4 sm:$0xff]  }
 0x1d8   : > { %3249 = vmatprep.subr.bf16.mxu0 %v5425_v26  ;;  %3507 = vmatprep.subr.bf16.mxu1 %v5427_v30  ;;  %v5479_v63 = vld [vmem:[%s6627_s27 + $0x1c4] ss:$16 sps:$4 sm:$0xff]   ;;  %v5481_v0 = vld [vmem:[%s6627_s27 + $0x1cc] ss:$16 sps:$4 sm:$0xff]   ;;  %v5483_v1 = vld [vmem:[%s6627_s27 + $0x1c0] ss:$16 sps:$4 sm:$0xff]  }
 0x1d9   : > { %v5484_v2 = vld [vmem:[%s6627_s27 + $0x1c8] ss:$16 sps:$4 sm:$0xff]   ;;  %v5485_v3 = vld [vmem:[%s6627_s27 + $0x1e4] ss:$16 sps:$4 sm:$0xff]   ;;  %v5487_v4 = vld [vmem:[%s6627_s27 + $0x1ec] ss:$16 sps:$4 sm:$0xff]  }
 0x1da   : > { %v5489_v5 = vld [vmem:[%s6627_s27 + $0x1e0] ss:$16 sps:$4 sm:$0xff]   ;;  %v5490_v6 = vld [vmem:[%s6627_s27 + $0x1e8] ss:$16 sps:$4 sm:$0xff]   ;;  %v5493_v7 = vld [vmem:[%s6627_s27 + $0x204] ss:$16 sps:$4 sm:$0xff]  }
 0x1db   : > { %3250 = vmatpush1.bf16.msra.mxu0 %v5429_v33  ;;  %3508 = vmatpush1.bf16.msra.mxu1 %v5430_v34  ;;  %v5496_v8 = vld [vmem:[%s6627_s27 + $0x20c] ss:$16 sps:$4 sm:$0xff]   ;;  %v5491_v9 = vld [vmem:[%s6627_s27 + $0x200] ss:$16 sps:$4 sm:$0xff]   ;;  %v5494_v10 = vld [vmem:[%s6627_s27 + $0x208] ss:$16 sps:$4 sm:$0xff]  }
 0x1dc   : > { %3251 = vmatprep.subr.bf16.mxu0 %v5431_v35  ;;  %3509 = vmatprep.subr.bf16.mxu1 %v5433_v36  ;;  %v899_v11 = vld [vmem:[#allocation2] sm:$0xff]  ;;  %v5499_v12 = vld [vmem:[%s6627_s27 + $0x224] ss:$16 sps:$4 sm:$0xff]   ;;  %v5500_v15 = vld [vmem:[%s6627_s27 + $0x228] ss:$16 sps:$4 sm:$0xff]   ;;  %s1296_s21 = scalar_lea.vmem [#allocation12], %s4645_s10 }
 0x1dd   : > { %v5502_v13 = vld [vmem:[%s6627_s27 + $0x22c] ss:$16 sps:$4 sm:$0xff]   ;;  %v5497_v14 = vld [vmem:[%s6627_s27 + $0x220] ss:$16 sps:$4 sm:$0xff]   ;;  %v5505_v16 = vld [vmem:[%s6627_s27 + $0x244] ss:$16 sps:$4 sm:$0xff]  }
 0x1de   : > { %v5508_v17 = vld [vmem:[%s6627_s27 + $0x24c] ss:$16 sps:$4 sm:$0xff]   ;;  %v5503_v18 = vld [vmem:[%s6627_s27 + $0x240] ss:$16 sps:$4 sm:$0xff]   ;;  %v5506_v19 = vld [vmem:[%s6627_s27 + $0x248] ss:$16 sps:$4 sm:$0xff]  }
 0x1df   : > { %3252 = vmatpush1.bf16.msra.mxu0 %v5435_v37  ;;  %3510 = vmatpush1.bf16.msra.mxu1 %v5436_v38  ;;  %v5511_v20 = vld [vmem:[%s6627_s27 + $0x264] ss:$16 sps:$4 sm:$0xff]   ;;  %v5514_v21 = vld [vmem:[%s6627_s27 + $0x26c] ss:$16 sps:$4 sm:$0xff]   ;;  %v5509_v22 = vld [vmem:[%s6627_s27 + $0x260] ss:$16 sps:$4 sm:$0xff]  }
 0x1e0   : > { %3253 = vmatprep.subr.bf16.mxu0 %v5437_v39  ;;  %3511 = vmatprep.subr.bf16.mxu1 %v5439_v40  ;;  %v5512_v23 = vld [vmem:[%s6627_s27 + $0x268] ss:$16 sps:$4 sm:$0xff]   ;;  %v5517_v24 = vld [vmem:[%s6627_s27 + $0x284] ss:$16 sps:$4 sm:$0xff]   ;;  %v5520_v25 = vld [vmem:[%s6627_s27 + $0x28c] ss:$16 sps:$4 sm:$0xff]  }
 0x1e1   : > { %v5515_v26 = vld [vmem:[%s6627_s27 + $0x280] ss:$16 sps:$4 sm:$0xff]   ;;  %v5518_v30 = vld [vmem:[%s6627_s27 + $0x288] ss:$16 sps:$4 sm:$0xff]   ;;  %v5523_v33 = vld [vmem:[%s6627_s27 + $0x2a4] ss:$16 sps:$4 sm:$0xff]  }
 0x1e2   : > { %v5526_v34 = vld [vmem:[%s6627_s27 + $0x2ac] ss:$16 sps:$4 sm:$0xff]   ;;  %v5521_v35 = vld [vmem:[%s6627_s27 + $0x2a0] ss:$16 sps:$4 sm:$0xff]   ;;  %v5524_v36 = vld [vmem:[%s6627_s27 + $0x2a8] ss:$16 sps:$4 sm:$0xff]  }
 0x1e3   : > { %3254 = vmatpush1.bf16.msra.mxu0 %v5441_v41  ;;  %3512 = vmatpush1.bf16.msra.mxu1 %v5442_v42  ;;  %v5529_v37 = vld [vmem:[%s6627_s27 + $0x2c4] ss:$16 sps:$4 sm:$0xff]   ;;  %v5532_v38 = vld [vmem:[%s6627_s27 + $0x2cc] ss:$16 sps:$4 sm:$0xff]   ;;  %v5527_v40 = vld [vmem:[%s6627_s27 + $0x2c0] ss:$16 sps:$4 sm:$0xff]  }
 0x1e4   : > { %3255 = vmatprep.subr.bf16.mxu0 %v5443_v28  ;;  %3513 = vmatprep.subr.bf16.mxu1 %v5445_v43  ;;  %v902_v39 = vld [vmem:[#allocation2 + $0x18] sm:$0xff]  ;;  %v5538_v28 = vld [vmem:[%s6627_s27 + $0x2ec] ss:$16 sps:$4 sm:$0xff]   ;;  %v5533_v43 = vld [vmem:[%s6627_s27 + $0x2e0] ss:$16 sps:$4 sm:$0xff]   ;;  %s5102_s11 = sshll.u32 %s6394_s30, 5 }
 0x1e5   : > { %v5530_v41 = vld [vmem:[%s6627_s27 + $0x2c8] ss:$16 sps:$4 sm:$0xff]   ;;  %v5535_v42 = vld [vmem:[%s6627_s27 + $0x2e4] ss:$16 sps:$4 sm:$0xff]   ;;  %s3768_s9 = scalar_lea.vmem [#allocation3], %s5102_s11  ;;  %p5031_p2 = scmp.ne.s32.totalorder %s6394_s30, 1 }
 0x1e6   : > { %v5554_v52 = vld [vmem:[%s6627_s27 + $0x348] ss:$16 sps:$4 sm:$0xff]  }
 0x1e7   : > { %3256 = vmatpush1.bf16.msra.mxu0 %v5447_v44  ;;  %3514 = vmatpush1.bf16.msra.mxu1 %v5448_v29  ;;  %v5536_v44 = vld [vmem:[%s6627_s27 + $0x2e8] ss:$16 sps:$4 sm:$0xff]   ;;  %v5541_v29 = vld [vmem:[%s6627_s27 + $0x304] ss:$16 sps:$4 sm:$0xff]  }
 0x1e8   : > { %3257 = vmatprep.subr.bf16.mxu0 %v5449_v45  ;;  %3515 = vmatprep.subr.bf16.mxu1 %v5451_v46  ;;  %v5544_v45 = vld [vmem:[%s6627_s27 + $0x30c] ss:$16 sps:$4 sm:$0xff]   ;;  %v5539_v46 = vld [vmem:[%s6627_s27 + $0x300] ss:$16 sps:$4 sm:$0xff]  }
 0x1eb   : > { %3258 = vmatpush1.bf16.msra.mxu0 %v5453_v31  ;;  %3516 = vmatpush1.bf16.msra.mxu1 %v5454_v47  ;;  %v5542_v31 = vld [vmem:[%s6627_s27 + $0x308] ss:$16 sps:$4 sm:$0xff]   ;;  %v5547_v47 = vld [vmem:[%s6627_s27 + $0x324] ss:$16 sps:$4 sm:$0xff]  }
 0x1ec   : > { %3259 = vmatprep.subr.bf16.mxu0 %v5455_v27  ;;  %3517 = vmatprep.subr.bf16.mxu1 %v5457_v32  ;;  %v5550_v27 = vld [vmem:[%s6627_s27 + $0x32c] ss:$16 sps:$4 sm:$0xff]   ;;  %v5545_v32 = vld [vmem:[%s6627_s27 + $0x320] ss:$16 sps:$4 sm:$0xff]  }
 0x1ef   : > { %3260 = vmatpush1.bf16.msra.mxu0 %v5459_v48  ;;  %3518 = vmatpush1.bf16.msra.mxu1 %v5460_v49  ;;  %v5548_v48 = vld [vmem:[%s6627_s27 + $0x328] ss:$16 sps:$4 sm:$0xff]   ;;  %v5553_v49 = vld [vmem:[%s6627_s27 + $0x344] ss:$16 sps:$4 sm:$0xff]  }
 0x1f0   : > { %3261 = vmatprep.subr.bf16.mxu0 %v5461_v50  ;;  %3519 = vmatprep.subr.bf16.mxu1 %v5463_v51  ;;  %v5556_v50 = vld [vmem:[%s6627_s27 + $0x34c] ss:$16 sps:$4 sm:$0xff]   ;;  %v5551_v51 = vld [vmem:[%s6627_s27 + $0x340] ss:$16 sps:$4 sm:$0xff]  }
 0x1f3   : > { %3262 = vmatpush1.bf16.msra.mxu0 %v5465_v53  ;;  %3520 = vmatpush1.bf16.msra.mxu1 %v5466_v54  ;;  %v5559_v53 = vld [vmem:[%s6627_s27 + $0x364] ss:$16 sps:$4 sm:$0xff]   ;;  %v5562_v54 = vld [vmem:[%s6627_s27 + $0x36c] ss:$16 sps:$4 sm:$0xff]  }
 0x1f4   : > { %3263 = vmatprep.subr.bf16.mxu0 %v5467_v55  ;;  %3521 = vmatprep.subr.bf16.mxu1 %v5469_v56  ;;  %v5557_v55 = vld [vmem:[%s6627_s27 + $0x360] ss:$16 sps:$4 sm:$0xff]   ;;  %v5560_v56 = vld [vmem:[%s6627_s27 + $0x368] ss:$16 sps:$4 sm:$0xff]  }
 0x1f7   : > { %3264 = vmatpush1.bf16.msra.mxu0 %v5471_v57  ;;  %3522 = vmatpush1.bf16.msra.mxu1 %v5472_v58  ;;  %v5565_v57 = vld [vmem:[%s6627_s27 + $0x384] ss:$16 sps:$4 sm:$0xff]   ;;  %v5568_v58 = vld [vmem:[%s6627_s27 + $0x38c] ss:$16 sps:$4 sm:$0xff]  }
 0x1f8   : > { %3265 = vmatprep.subr.bf16.mxu0 %v5473_v59  ;;  %3523 = vmatprep.subr.bf16.mxu1 %v5475_v60  ;;  %v5563_v59 = vld [vmem:[%s6627_s27 + $0x380] ss:$16 sps:$4 sm:$0xff]   ;;  %v5566_v60 = vld [vmem:[%s6627_s27 + $0x388] ss:$16 sps:$4 sm:$0xff]  }
 0x1fb   : > { %3266 = vmatpush1.bf16.msra.mxu0 %v5477_v61  ;;  %3524 = vmatpush1.bf16.msra.mxu1 %v5478_v62  ;;  %v5571_v61 = vld [vmem:[%s6627_s27 + $0x3a4] ss:$16 sps:$4 sm:$0xff]   ;;  %v5574_v62 = vld [vmem:[%s6627_s27 + $0x3ac] ss:$16 sps:$4 sm:$0xff]  }
 0x1fc   : > { %3267 = vmatprep.subr.bf16.mxu0 %v5479_v63  ;;  %3525 = vmatprep.subr.bf16.mxu1 %v5481_v0  ;;  %v5569_v63 = vld [vmem:[%s6627_s27 + $0x3a0] ss:$16 sps:$4 sm:$0xff]   ;;  %v5572_v0 = vld [vmem:[%s6627_s27 + $0x3a8] ss:$16 sps:$4 sm:$0xff]  }
 0x1ff   : > { %3268 = vmatpush1.bf16.msra.mxu0 %v5483_v1  ;;  %3526 = vmatpush1.bf16.msra.mxu1 %v5484_v2  ;;  %v5577_v1 = vld [vmem:[%s6627_s27 + $0x3c4] ss:$16 sps:$4 sm:$0xff]   ;;  %v5580_v2 = vld [vmem:[%s6627_s27 + $0x3cc] ss:$16 sps:$4 sm:$0xff]  }
 0x200   : > { %3269 = vmatprep.subr.bf16.mxu0 %v5485_v3  ;;  %3527 = vmatprep.subr.bf16.mxu1 %v5487_v4  ;;  %v5575_v3 = vld [vmem:[%s6627_s27 + $0x3c0] ss:$16 sps:$4 sm:$0xff]   ;;  %v5578_v4 = vld [vmem:[%s6627_s27 + $0x3c8] ss:$16 sps:$4 sm:$0xff]  }
 0x203   : > { %3270 = vmatpush1.bf16.msra.mxu0 %v5489_v5  ;;  %3528 = vmatpush1.bf16.msra.mxu1 %v5490_v6  ;;  %v5583_v5 = vld [vmem:[%s6627_s27 + $0x3e4] ss:$16 sps:$4 sm:$0xff]   ;;  %v5586_v6 = vld [vmem:[%s6627_s27 + $0x3ec] ss:$16 sps:$4 sm:$0xff]  }
 0x204   : > { %3282 = vmatprep.subr.bf16.mxu0 %v5493_v7  ;;  %3540 = vmatprep.subr.bf16.mxu1 %v5496_v8  ;;  %v5581_v7 = vld [vmem:[%s6627_s27 + $0x3e0] ss:$16 sps:$4 sm:$0xff]   ;;  %v5584_v8 = vld [vmem:[%s6627_s27 + $0x3e8] ss:$16 sps:$4 sm:$0xff]  }
 0x206   : > { %3272 = vmatmul.mubr.bf16.vlgmr.msra.gmra.mrb[0].mxu0 %v899_v11  ;;  %3530 = vmatmul.mubr.bf16.vlgmr.msra.gmra.mrb[0].mxu1 %v899_v11  ;;  %v5587_v11 = vld [vmem:[%s6627_s27 + $0x400] ss:$16 sps:$4 sm:$0xff]  }
 0x207   : > { %3283 = vmatpush1.bf16.msra.mxu0 %v5491_v9  ;;  %3541 = vmatpush1.bf16.msra.mxu1 %v5494_v10  ;;  %v5589_v9 = vld [vmem:[%s6627_s27 + $0x404] ss:$16 sps:$4 sm:$0xff]   ;;  %v5592_v10 = vld [vmem:[%s6627_s27 + $0x40c] ss:$16 sps:$4 sm:$0xff]  }
 0x208   : > { %3284 = vmatprep.subr.bf16.mxu0 %v5499_v12  ;;  %3542 = vmatprep.subr.bf16.mxu1 %v5502_v13  ;;  %v5590_v12 = vld [vmem:[%s6627_s27 + $0x408] ss:$16 sps:$4 sm:$0xff]   ;;  %v901_v13 = vld [vmem:[#allocation2 + $0x10] sm:$0xff] }
 0x209   : > { %3314 = vmatprep.mubr.bf16.mxu0 %v902_v39  ;;  %3572 = vmatprep.mubr.bf16.mxu1 %v902_v39  ;;  %v5620_v39 = vld [vmem:[%s6627_s27 + $0x4a8] ss:$16 sps:$4 sm:$0xff]  }
 0x20b   : > { %3285 = vmatpush1.bf16.msra.mxu0 %v5497_v14  ;;  %3543 = vmatpush1.bf16.msra.mxu1 %v5500_v15  ;;  %v5595_v14 = vld [vmem:[%s6627_s27 + $0x424] ss:$16 sps:$4 sm:$0xff]   ;;  %v5598_v15 = vld [vmem:[%s6627_s27 + $0x42c] ss:$16 sps:$4 sm:$0xff]  }
 0x20c   : > { %3286 = vmatprep.subr.bf16.mxu0 %v5505_v16  ;;  %3544 = vmatprep.subr.bf16.mxu1 %v5508_v17  ;;  %v904_v16 = vld [vmem:[#allocation2 + $0x28] sm:$0xff]  ;;  %v5593_v17 = vld [vmem:[%s6627_s27 + $0x420] ss:$16 sps:$4 sm:$0xff]  }
 0x20f   : > { %3287 = vmatpush1.bf16.msra.mxu0 %v5503_v18  ;;  %3545 = vmatpush1.bf16.msra.mxu1 %v5506_v19  ;;  %v5596_v18 = vld [vmem:[%s6627_s27 + $0x428] ss:$16 sps:$4 sm:$0xff]   ;;  %v5601_v19 = vld [vmem:[%s6627_s27 + $0x444] ss:$16 sps:$4 sm:$0xff]  }
 0x210   : > { %3288 = vmatprep.subr.bf16.mxu0 %v5511_v20  ;;  %3546 = vmatprep.subr.bf16.mxu1 %v5514_v21  ;;  %v5604_v20 = vld [vmem:[%s6627_s27 + $0x44c] ss:$16 sps:$4 sm:$0xff]   ;;  %v5599_v21 = vld [vmem:[%s6627_s27 + $0x440] ss:$16 sps:$4 sm:$0xff]  }
 0x213   : > { %3289 = vmatpush1.bf16.msra.mxu0 %v5509_v22  ;;  %3547 = vmatpush1.bf16.msra.mxu1 %v5512_v23  ;;  %v5602_v22 = vld [vmem:[%s6627_s27 + $0x448] ss:$16 sps:$4 sm:$0xff]   ;;  %v5607_v23 = vld [vmem:[%s6627_s27 + $0x464] ss:$16 sps:$4 sm:$0xff]  }
 0x214   : > { %3290 = vmatprep.subr.bf16.mxu0 %v5517_v24  ;;  %3548 = vmatprep.subr.bf16.mxu1 %v5520_v25  ;;  %v5610_v24 = vld [vmem:[%s6627_s27 + $0x46c] ss:$16 sps:$4 sm:$0xff]   ;;  %v5605_v25 = vld [vmem:[%s6627_s27 + $0x460] ss:$16 sps:$4 sm:$0xff]  }
 0x217   : > { %3291 = vmatpush1.bf16.msra.mxu0 %v5515_v26  ;;  %3549 = vmatpush1.bf16.msra.mxu1 %v5518_v30  ;;  %v5608_v26 = vld [vmem:[%s6627_s27 + $0x468] ss:$16 sps:$4 sm:$0xff]   ;;  %v5613_v30 = vld [vmem:[%s6627_s27 + $0x484] ss:$16 sps:$4 sm:$0xff]  }
 0x218   : > { %3292 = vmatprep.subr.bf16.mxu0 %v5523_v33  ;;  %3550 = vmatprep.subr.bf16.mxu1 %v5526_v34  ;;  %v5616_v33 = vld [vmem:[%s6627_s27 + $0x48c] ss:$16 sps:$4 sm:$0xff]   ;;  %v5611_v34 = vld [vmem:[%s6627_s27 + $0x480] ss:$16 sps:$4 sm:$0xff]  }
 0x21b   : > { %3293 = vmatpush1.bf16.msra.mxu0 %v5521_v35  ;;  %3551 = vmatpush1.bf16.msra.mxu1 %v5524_v36  ;;  %v5614_v35 = vld [vmem:[%s6627_s27 + $0x488] ss:$16 sps:$4 sm:$0xff]   ;;  %v5619_v36 = vld [vmem:[%s6627_s27 + $0x4a4] ss:$16 sps:$4 sm:$0xff]  }
 0x21c   : > { %3294 = vmatprep.subr.bf16.mxu0 %v5529_v37  ;;  %3552 = vmatprep.subr.bf16.mxu1 %v5532_v38  ;;  %v5622_v37 = vld [vmem:[%s6627_s27 + $0x4ac] ss:$16 sps:$4 sm:$0xff]   ;;  %v5617_v38 = vld [vmem:[%s6627_s27 + $0x4a0] ss:$16 sps:$4 sm:$0xff]  }
 0x21f   : > { %3295 = vmatpush1.bf16.msra.mxu0 %v5527_v40  ;;  %3553 = vmatpush1.bf16.msra.mxu1 %v5530_v41  ;;  %v5625_v40 = vld [vmem:[%s6627_s27 + $0x4c4] ss:$16 sps:$4 sm:$0xff]   ;;  %v5628_v41 = vld [vmem:[%s6627_s27 + $0x4cc] ss:$16 sps:$4 sm:$0xff]  }
 0x220   : > { %3296 = vmatprep.subr.bf16.mxu0 %v5535_v42  ;;  %3554 = vmatprep.subr.bf16.mxu1 %v5538_v28  ;;  %v5623_v42 = vld [vmem:[%s6627_s27 + $0x4c0] ss:$16 sps:$4 sm:$0xff]   ;;  %v5626_v28 = vld [vmem:[%s6627_s27 + $0x4c8] ss:$16 sps:$4 sm:$0xff]  }
 0x223   : > { %3297 = vmatpush1.bf16.msra.mxu0 %v5533_v43  ;;  %3555 = vmatpush1.bf16.msra.mxu1 %v5536_v44  ;;  %v5631_v43 = vld [vmem:[%s6627_s27 + $0x4e4] ss:$16 sps:$4 sm:$0xff]   ;;  %v5634_v44 = vld [vmem:[%s6627_s27 + $0x4ec] ss:$16 sps:$4 sm:$0xff]  }
 0x224   : > { %3298 = vmatprep.subr.bf16.mxu0 %v5541_v29  ;;  %3556 = vmatprep.subr.bf16.mxu1 %v5544_v45  ;;  %v5629_v29 = vld [vmem:[%s6627_s27 + $0x4e0] ss:$16 sps:$4 sm:$0xff]   ;;  %v5632_v45 = vld [vmem:[%s6627_s27 + $0x4e8] ss:$16 sps:$4 sm:$0xff]  }
 0x227   : > { %3299 = vmatpush1.bf16.msra.mxu0 %v5539_v46  ;;  %3557 = vmatpush1.bf16.msra.mxu1 %v5542_v31  ;;  %v5637_v46 = vld [vmem:[%s6627_s27 + $0x504] ss:$16 sps:$4 sm:$0xff]   ;;  %v5640_v31 = vld [vmem:[%s6627_s27 + $0x50c] ss:$16 sps:$4 sm:$0xff]  }
 0x228   : > { %3300 = vmatprep.subr.bf16.mxu0 %v5547_v47  ;;  %3558 = vmatprep.subr.bf16.mxu1 %v5550_v27  ;;  %v5635_v47 = vld [vmem:[%s6627_s27 + $0x500] ss:$16 sps:$4 sm:$0xff]   ;;  %v5638_v27 = vld [vmem:[%s6627_s27 + $0x508] ss:$16 sps:$4 sm:$0xff]  }
 0x22b   : > { %3301 = vmatpush1.bf16.msra.mxu0 %v5545_v32  ;;  %3559 = vmatpush1.bf16.msra.mxu1 %v5548_v48  ;;  %v5643_v32 = vld [vmem:[%s6627_s27 + $0x524] ss:$16 sps:$4 sm:$0xff]   ;;  %v5646_v48 = vld [vmem:[%s6627_s27 + $0x52c] ss:$16 sps:$4 sm:$0xff]  }
 0x22c   : > { %3302 = vmatprep.subr.bf16.mxu0 %v5553_v49  ;;  %3560 = vmatprep.subr.bf16.mxu1 %v5556_v50  ;;  %v5641_v49 = vld [vmem:[%s6627_s27 + $0x520] ss:$16 sps:$4 sm:$0xff]   ;;  %v5644_v50 = vld [vmem:[%s6627_s27 + $0x528] ss:$16 sps:$4 sm:$0xff]  }
 0x22f   : > { %3303 = vmatpush1.bf16.msra.mxu0 %v5551_v51  ;;  %3561 = vmatpush1.bf16.msra.mxu1 %v5554_v52  ;;  %v5649_v51 = vld [vmem:[%s6627_s27 + $0x544] ss:$16 sps:$4 sm:$0xff]   ;;  %v5652_v52 = vld [vmem:[%s6627_s27 + $0x54c] ss:$16 sps:$4 sm:$0xff]  }
 0x230   : > { %3304 = vmatprep.subr.bf16.mxu0 %v5559_v53  ;;  %3562 = vmatprep.subr.bf16.mxu1 %v5562_v54  ;;  %v5647_v53 = vld [vmem:[%s6627_s27 + $0x540] ss:$16 sps:$4 sm:$0xff]   ;;  %v5650_v54 = vld [vmem:[%s6627_s27 + $0x548] ss:$16 sps:$4 sm:$0xff]  }
 0x233   : > { %3305 = vmatpush1.bf16.msra.mxu0 %v5557_v55  ;;  %3563 = vmatpush1.bf16.msra.mxu1 %v5560_v56  ;;  %v5655_v55 = vld [vmem:[%s6627_s27 + $0x564] ss:$16 sps:$4 sm:$0xff]   ;;  %v5658_v56 = vld [vmem:[%s6627_s27 + $0x56c] ss:$16 sps:$4 sm:$0xff]  }
 0x234   : > { %3306 = vmatprep.subr.bf16.mxu0 %v5565_v57  ;;  %3564 = vmatprep.subr.bf16.mxu1 %v5568_v58  ;;  %v5653_v57 = vld [vmem:[%s6627_s27 + $0x560] ss:$16 sps:$4 sm:$0xff]   ;;  %v5656_v58 = vld [vmem:[%s6627_s27 + $0x568] ss:$16 sps:$4 sm:$0xff]  }
 0x237   : > { %3307 = vmatpush1.bf16.msra.mxu0 %v5563_v59  ;;  %3565 = vmatpush1.bf16.msra.mxu1 %v5566_v60  ;;  %v5661_v59 = vld [vmem:[%s6627_s27 + $0x584] ss:$16 sps:$4 sm:$0xff]   ;;  %v5664_v60 = vld [vmem:[%s6627_s27 + $0x58c] ss:$16 sps:$4 sm:$0xff]  }
 0x238   : > { %3308 = vmatprep.subr.bf16.mxu0 %v5571_v61  ;;  %3566 = vmatprep.subr.bf16.mxu1 %v5574_v62  ;;  %v5659_v61 = vld [vmem:[%s6627_s27 + $0x580] ss:$16 sps:$4 sm:$0xff]   ;;  %v5662_v62 = vld [vmem:[%s6627_s27 + $0x588] ss:$16 sps:$4 sm:$0xff]  }
 0x23b   : > { %3309 = vmatpush1.bf16.msra.mxu0 %v5569_v63  ;;  %3567 = vmatpush1.bf16.msra.mxu1 %v5572_v0  ;;  %v5667_v63 = vld [vmem:[%s6627_s27 + $0x5a4] ss:$16 sps:$4 sm:$0xff]   ;;  %v5670_v0 = vld [vmem:[%s6627_s27 + $0x5ac] ss:$16 sps:$4 sm:$0xff]  }
 0x23c   : > { %3310 = vmatprep.subr.bf16.mxu0 %v5577_v1  ;;  %3568 = vmatprep.subr.bf16.mxu1 %v5580_v2  ;;  %v5665_v1 = vld [vmem:[%s6627_s27 + $0x5a0] ss:$16 sps:$4 sm:$0xff]   ;;  %v5668_v2 = vld [vmem:[%s6627_s27 + $0x5a8] ss:$16 sps:$4 sm:$0xff]  }
 0x23f   : > { %3311 = vmatpush1.bf16.msra.mxu0 %v5575_v3  ;;  %3569 = vmatpush1.bf16.msra.mxu1 %v5578_v4  ;;  %v5673_v3 = vld [vmem:[%s6627_s27 + $0x5c4] ss:$16 sps:$4 sm:$0xff]   ;;  %v5676_v4 = vld [vmem:[%s6627_s27 + $0x5cc] ss:$16 sps:$4 sm:$0xff]  }
 0x240   : > { %3312 = vmatprep.subr.bf16.mxu0 %v5583_v5  ;;  %3570 = vmatprep.subr.bf16.mxu1 %v5586_v6  ;;  %v5671_v5 = vld [vmem:[%s6627_s27 + $0x5c0] ss:$16 sps:$4 sm:$0xff]   ;;  %v5674_v6 = vld [vmem:[%s6627_s27 + $0x5c8] ss:$16 sps:$4 sm:$0xff]  }
 0x243   : > { %3313 = vmatpush1.bf16.msra.mxu0 %v5581_v7  ;;  %3571 = vmatpush1.bf16.msra.mxu1 %v5584_v8  ;;  %v5679_v7 = vld [vmem:[%s6627_s27 + $0x5e4] ss:$16 sps:$4 sm:$0xff]   ;;  %v5682_v8 = vld [vmem:[%s6627_s27 + $0x5ec] ss:$16 sps:$4 sm:$0xff]  }
 0x244   : > { %3325 = vmatprep.subr.bf16.mxu0 %v5589_v9  ;;  %3583 = vmatprep.subr.bf16.mxu1 %v5592_v10  ;;  %v5677_v9 = vld [vmem:[%s6627_s27 + $0x5e0] ss:$16 sps:$4 sm:$0xff]   ;;  %v5680_v10 = vld [vmem:[%s6627_s27 + $0x5e8] ss:$16 sps:$4 sm:$0xff]  }
 0x246   : > { %3315 = vmatmul.mubr.bf16.vlgmr.msra.gmra.mrb[0].mxu0 %v901_v13  ;;  %3573 = vmatmul.mubr.bf16.vlgmr.msra.gmra.mrb[0].mxu1 %v901_v13  ;;  %v5683_v13 = vld [vmem:[%s6627_s27 + $0x600] ss:$16 sps:$4 sm:$0xff]  }
 0x247   : > { %3326 = vmatpush1.bf16.msra.mxu0 %v5587_v11  ;;  %3584 = vmatpush1.bf16.msra.mxu1 %v5590_v12  ;;  %v5685_v11 = vld [vmem:[%s6627_s27 + $0x604] ss:$16 sps:$4 sm:$0xff]   ;;  %v5688_v12 = vld [vmem:[%s6627_s27 + $0x60c] ss:$16 sps:$4 sm:$0xff]  }
 0x248   : > { %3327 = vmatprep.subr.bf16.mxu0 %v5595_v14  ;;  %3585 = vmatprep.subr.bf16.mxu1 %v5598_v15  ;;  %v5686_v14 = vld [vmem:[%s6627_s27 + $0x608] ss:$16 sps:$4 sm:$0xff]   ;;  %v903_v15 = vld [vmem:[#allocation2 + $0x20] sm:$0xff] }
 0x249   : > { %3357 = vmatprep.mubr.bf16.mxu0 %v904_v16  ;;  %3615 = vmatprep.mubr.bf16.mxu1 %v904_v16  ;;  %v5691_v16 = vld [vmem:[%s6627_s27 + $0x624] ss:$16 sps:$4 sm:$0xff]  }
 0x24b   : > { %3328 = vmatpush1.bf16.msra.mxu0 %v5593_v17  ;;  %3586 = vmatpush1.bf16.msra.mxu1 %v5596_v18  ;;  %v5694_v17 = vld [vmem:[%s6627_s27 + $0x62c] ss:$16 sps:$4 sm:$0xff]   ;;  %v5689_v18 = vld [vmem:[%s6627_s27 + $0x620] ss:$16 sps:$4 sm:$0xff]  }
 0x24c   : > { %3329 = vmatprep.subr.bf16.mxu0 %v5601_v19  ;;  %3587 = vmatprep.subr.bf16.mxu1 %v5604_v20  ;;  %v5692_v19 = vld [vmem:[%s6627_s27 + $0x628] ss:$16 sps:$4 sm:$0xff]  }
 0x24d   : > { %v906_v20 = vld [vmem:[#allocation2 + $0x38] sm:$0xff] }
 0x24f   : > { %3330 = vmatpush1.bf16.msra.mxu0 %v5599_v21  ;;  %3588 = vmatpush1.bf16.msra.mxu1 %v5602_v22  ;;  %v5697_v21 = vld [vmem:[%s6627_s27 + $0x644] ss:$16 sps:$4 sm:$0xff]   ;;  %v5700_v22 = vld [vmem:[%s6627_s27 + $0x64c] ss:$16 sps:$4 sm:$0xff]  }
 0x250   : > { %3331 = vmatprep.subr.bf16.mxu0 %v5607_v23  ;;  %3589 = vmatprep.subr.bf16.mxu1 %v5610_v24  ;;  %v5695_v23 = vld [vmem:[%s6627_s27 + $0x640] ss:$16 sps:$4 sm:$0xff]   ;;  %v5698_v24 = vld [vmem:[%s6627_s27 + $0x648] ss:$16 sps:$4 sm:$0xff]  }
 0x253   : > { %3332 = vmatpush1.bf16.msra.mxu0 %v5605_v25  ;;  %3590 = vmatpush1.bf16.msra.mxu1 %v5608_v26  ;;  %v5703_v25 = vld [vmem:[%s6627_s27 + $0x664] ss:$16 sps:$4 sm:$0xff]   ;;  %v5706_v26 = vld [vmem:[%s6627_s27 + $0x66c] ss:$16 sps:$4 sm:$0xff]  }
 0x254   : > { %3333 = vmatprep.subr.bf16.mxu0 %v5613_v30  ;;  %3591 = vmatprep.subr.bf16.mxu1 %v5616_v33  ;;  %v5701_v30 = vld [vmem:[%s6627_s27 + $0x660] ss:$16 sps:$4 sm:$0xff]   ;;  %v5704_v33 = vld [vmem:[%s6627_s27 + $0x668] ss:$16 sps:$4 sm:$0xff]  }
 0x257   : > { %3334 = vmatpush1.bf16.msra.mxu0 %v5611_v34  ;;  %3592 = vmatpush1.bf16.msra.mxu1 %v5614_v35  ;;  %v5709_v34 = vld [vmem:[%s6627_s27 + $0x684] ss:$16 sps:$4 sm:$0xff]   ;;  %v5712_v35 = vld [vmem:[%s6627_s27 + $0x68c] ss:$16 sps:$4 sm:$0xff]  }
 0x258   : > { %3335 = vmatprep.subr.bf16.mxu0 %v5619_v36  ;;  %3593 = vmatprep.subr.bf16.mxu1 %v5622_v37  ;;  %v5707_v36 = vld [vmem:[%s6627_s27 + $0x680] ss:$16 sps:$4 sm:$0xff]   ;;  %v5710_v37 = vld [vmem:[%s6627_s27 + $0x688] ss:$16 sps:$4 sm:$0xff]  }
 0x25b   : > { %3336 = vmatpush1.bf16.msra.mxu0 %v5617_v38  ;;  %3594 = vmatpush1.bf16.msra.mxu1 %v5620_v39  ;;  %v5715_v38 = vld [vmem:[%s6627_s27 + $0x6a4] ss:$16 sps:$4 sm:$0xff]   ;;  %v5718_v39 = vld [vmem:[%s6627_s27 + $0x6ac] ss:$16 sps:$4 sm:$0xff]  }
 0x25c   : > { %3337 = vmatprep.subr.bf16.mxu0 %v5625_v40  ;;  %3595 = vmatprep.subr.bf16.mxu1 %v5628_v41  ;;  %v5713_v40 = vld [vmem:[%s6627_s27 + $0x6a0] ss:$16 sps:$4 sm:$0xff]   ;;  %v5716_v41 = vld [vmem:[%s6627_s27 + $0x6a8] ss:$16 sps:$4 sm:$0xff]  }
 0x25f   : > { %3338 = vmatpush1.bf16.msra.mxu0 %v5623_v42  ;;  %3596 = vmatpush1.bf16.msra.mxu1 %v5626_v28  ;;  %v5721_v42 = vld [vmem:[%s6627_s27 + $0x6c4] ss:$16 sps:$4 sm:$0xff]   ;;  %v5724_v28 = vld [vmem:[%s6627_s27 + $0x6cc] ss:$16 sps:$4 sm:$0xff]  }
 0x260   : > { %3339 = vmatprep.subr.bf16.mxu0 %v5631_v43  ;;  %3597 = vmatprep.subr.bf16.mxu1 %v5634_v44  ;;  %v5719_v43 = vld [vmem:[%s6627_s27 + $0x6c0] ss:$16 sps:$4 sm:$0xff]   ;;  %v5722_v44 = vld [vmem:[%s6627_s27 + $0x6c8] ss:$16 sps:$4 sm:$0xff]  }
 0x263   : > { %3340 = vmatpush1.bf16.msra.mxu0 %v5629_v29  ;;  %3598 = vmatpush1.bf16.msra.mxu1 %v5632_v45  ;;  %v5727_v29 = vld [vmem:[%s6627_s27 + $0x6e4] ss:$16 sps:$4 sm:$0xff]   ;;  %v5730_v45 = vld [vmem:[%s6627_s27 + $0x6ec] ss:$16 sps:$4 sm:$0xff]  }
 0x264   : > { %3341 = vmatprep.subr.bf16.mxu0 %v5637_v46  ;;  %3599 = vmatprep.subr.bf16.mxu1 %v5640_v31  ;;  %v5725_v46 = vld [vmem:[%s6627_s27 + $0x6e0] ss:$16 sps:$4 sm:$0xff]   ;;  %v5728_v31 = vld [vmem:[%s6627_s27 + $0x6e8] ss:$16 sps:$4 sm:$0xff]  }
 0x267   : > { %3342 = vmatpush1.bf16.msra.mxu0 %v5635_v47  ;;  %3600 = vmatpush1.bf16.msra.mxu1 %v5638_v27  ;;  %v5733_v47 = vld [vmem:[%s6627_s27 + $0x704] ss:$16 sps:$4 sm:$0xff]   ;;  %v5736_v27 = vld [vmem:[%s6627_s27 + $0x70c] ss:$16 sps:$4 sm:$0xff]  }
 0x268   : > { %3343 = vmatprep.subr.bf16.mxu0 %v5643_v32  ;;  %3601 = vmatprep.subr.bf16.mxu1 %v5646_v48  ;;  %v5731_v32 = vld [vmem:[%s6627_s27 + $0x700] ss:$16 sps:$4 sm:$0xff]   ;;  %v5734_v48 = vld [vmem:[%s6627_s27 + $0x708] ss:$16 sps:$4 sm:$0xff]  }
 0x26b   : > { %3344 = vmatpush1.bf16.msra.mxu0 %v5641_v49  ;;  %3602 = vmatpush1.bf16.msra.mxu1 %v5644_v50  ;;  %v5739_v49 = vld [vmem:[%s6627_s27 + $0x724] ss:$16 sps:$4 sm:$0xff]   ;;  %v5742_v50 = vld [vmem:[%s6627_s27 + $0x72c] ss:$16 sps:$4 sm:$0xff]  }
 0x26c   : > { %3345 = vmatprep.subr.bf16.mxu0 %v5649_v51  ;;  %3603 = vmatprep.subr.bf16.mxu1 %v5652_v52  ;;  %v5737_v51 = vld [vmem:[%s6627_s27 + $0x720] ss:$16 sps:$4 sm:$0xff]   ;;  %v5740_v52 = vld [vmem:[%s6627_s27 + $0x728] ss:$16 sps:$4 sm:$0xff]  }
 0x26f   : > { %3346 = vmatpush1.bf16.msra.mxu0 %v5647_v53  ;;  %3604 = vmatpush1.bf16.msra.mxu1 %v5650_v54  ;;  %v5745_v53 = vld [vmem:[%s6627_s27 + $0x744] ss:$16 sps:$4 sm:$0xff]   ;;  %v5748_v54 = vld [vmem:[%s6627_s27 + $0x74c] ss:$16 sps:$4 sm:$0xff]  }
 0x270   : > { %3347 = vmatprep.subr.bf16.mxu0 %v5655_v55  ;;  %3605 = vmatprep.subr.bf16.mxu1 %v5658_v56  ;;  %v5743_v55 = vld [vmem:[%s6627_s27 + $0x740] ss:$16 sps:$4 sm:$0xff]   ;;  %v5746_v56 = vld [vmem:[%s6627_s27 + $0x748] ss:$16 sps:$4 sm:$0xff]  }
 0x273   : > { %3348 = vmatpush1.bf16.msra.mxu0 %v5653_v57  ;;  %3606 = vmatpush1.bf16.msra.mxu1 %v5656_v58  ;;  %v5751_v57 = vld [vmem:[%s6627_s27 + $0x764] ss:$16 sps:$4 sm:$0xff]   ;;  %v5754_v58 = vld [vmem:[%s6627_s27 + $0x76c] ss:$16 sps:$4 sm:$0xff]  }
 0x274   : > { %3349 = vmatprep.subr.bf16.mxu0 %v5661_v59  ;;  %3607 = vmatprep.subr.bf16.mxu1 %v5664_v60  ;;  %v5749_v59 = vld [vmem:[%s6627_s27 + $0x760] ss:$16 sps:$4 sm:$0xff]   ;;  %v5752_v60 = vld [vmem:[%s6627_s27 + $0x768] ss:$16 sps:$4 sm:$0xff]  }
 0x277   : > { %3350 = vmatpush1.bf16.msra.mxu0 %v5659_v61  ;;  %3608 = vmatpush1.bf16.msra.mxu1 %v5662_v62  ;;  %v5757_v61 = vld [vmem:[%s6627_s27 + $0x784] ss:$16 sps:$4 sm:$0xff]   ;;  %v5760_v62 = vld [vmem:[%s6627_s27 + $0x78c] ss:$16 sps:$4 sm:$0xff]  }
 0x278   : > { %3351 = vmatprep.subr.bf16.mxu0 %v5667_v63  ;;  %3609 = vmatprep.subr.bf16.mxu1 %v5670_v0  ;;  %v5755_v63 = vld [vmem:[%s6627_s27 + $0x780] ss:$16 sps:$4 sm:$0xff]   ;;  %v5758_v0 = vld [vmem:[%s6627_s27 + $0x788] ss:$16 sps:$4 sm:$0xff]  }
 0x27b   : > { %3352 = vmatpush1.bf16.msra.mxu0 %v5665_v1  ;;  %3610 = vmatpush1.bf16.msra.mxu1 %v5668_v2  ;;  %v5763_v1 = vld [vmem:[%s6627_s27 + $0x7a4] ss:$16 sps:$4 sm:$0xff]   ;;  %v5766_v2 = vld [vmem:[%s6627_s27 + $0x7ac] ss:$16 sps:$4 sm:$0xff]  }
 0x27c   : > { %3353 = vmatprep.subr.bf16.mxu0 %v5673_v3  ;;  %3611 = vmatprep.subr.bf16.mxu1 %v5676_v4  ;;  %v5761_v3 = vld [vmem:[%s6627_s27 + $0x7a0] ss:$16 sps:$4 sm:$0xff]   ;;  %v5764_v4 = vld [vmem:[%s6627_s27 + $0x7a8] ss:$16 sps:$4 sm:$0xff]  }
 0x27f   : > { %3354 = vmatpush1.bf16.msra.mxu0 %v5671_v5  ;;  %3612 = vmatpush1.bf16.msra.mxu1 %v5674_v6  ;;  %v5769_v5 = vld [vmem:[%s6627_s27 + $0x7c4] ss:$16 sps:$4 sm:$0xff]   ;;  %v5772_v6 = vld [vmem:[%s6627_s27 + $0x7cc] ss:$16 sps:$4 sm:$0xff]  }
 0x280   : > { %3355 = vmatprep.subr.bf16.mxu0 %v5679_v7  ;;  %3613 = vmatprep.subr.bf16.mxu1 %v5682_v8  ;;  %v5767_v7 = vld [vmem:[%s6627_s27 + $0x7c0] ss:$16 sps:$4 sm:$0xff]   ;;  %v5770_v8 = vld [vmem:[%s6627_s27 + $0x7c8] ss:$16 sps:$4 sm:$0xff]  }
 0x283   : > { %3356 = vmatpush1.bf16.msra.mxu0 %v5677_v9  ;;  %3614 = vmatpush1.bf16.msra.mxu1 %v5680_v10  ;;  %v5775_v9 = vld [vmem:[%s6627_s27 + $0x7e4] ss:$16 sps:$4 sm:$0xff]   ;;  %v5778_v10 = vld [vmem:[%s6627_s27 + $0x7ec] ss:$16 sps:$4 sm:$0xff]  }
 0x284   : > { %3368 = vmatprep.subr.bf16.mxu0 %v5685_v11  ;;  %3626 = vmatprep.subr.bf16.mxu1 %v5688_v12  ;;  %v5773_v11 = vld [vmem:[%s6627_s27 + $0x7e0] ss:$16 sps:$4 sm:$0xff]   ;;  %v5776_v12 = vld [vmem:[%s6627_s27 + $0x7e8] ss:$16 sps:$4 sm:$0xff]  }
 0x286   : > { %3358 = vmatmul.mubr.bf16.vlgmr.msra.gmra.mrb[0].mxu0 %v903_v15  ;;  %3616 = vmatmul.mubr.bf16.vlgmr.msra.gmra.mrb[0].mxu1 %v903_v15  ;;  %v5779_v15 = vld [vmem:[%s6627_s27 + $0x800] ss:$16 sps:$4 sm:$0xff]  }
 0x287   : > { %3369 = vmatpush1.bf16.msra.mxu0 %v5683_v13  ;;  %3627 = vmatpush1.bf16.msra.mxu1 %v5686_v14  ;;  %v5781_v13 = vld [vmem:[%s6627_s27 + $0x804] ss:$16 sps:$4 sm:$0xff]   ;;  %v5784_v14 = vld [vmem:[%s6627_s27 + $0x80c] ss:$16 sps:$4 sm:$0xff]  }
 0x288   : > { %3370 = vmatprep.subr.bf16.mxu0 %v5691_v16  ;;  %3628 = vmatprep.subr.bf16.mxu1 %v5694_v17  ;;  %v5782_v16 = vld [vmem:[%s6627_s27 + $0x808] ss:$16 sps:$4 sm:$0xff]   ;;  %v905_v17 = vld [vmem:[#allocation2 + $0x30] sm:$0xff] }
 0x289   : > { %3400 = vmatprep.mubr.bf16.mxu0 %v906_v20  ;;  %3658 = vmatprep.mubr.bf16.mxu1 %v906_v20  ;;  %v908_v20 = vld [vmem:[#allocation2 + $0x48] sm:$0xff] }
 0x28b   : > { %3371 = vmatpush1.bf16.msra.mxu0 %v5689_v18  ;;  %3629 = vmatpush1.bf16.msra.mxu1 %v5692_v19  ;;  %v5787_v18 = vld [vmem:[%s6627_s27 + $0x824] ss:$16 sps:$4 sm:$0xff]   ;;  %v5790_v19 = vld [vmem:[%s6627_s27 + $0x82c] ss:$16 sps:$4 sm:$0xff]  }
 0x28c   : > { %3372 = vmatprep.subr.bf16.mxu0 %v5697_v21  ;;  %3630 = vmatprep.subr.bf16.mxu1 %v5700_v22  ;;  %v5785_v21 = vld [vmem:[%s6627_s27 + $0x820] ss:$16 sps:$4 sm:$0xff]   ;;  %v5788_v22 = vld [vmem:[%s6627_s27 + $0x828] ss:$16 sps:$4 sm:$0xff]  }
 0x28f   : > { %3373 = vmatpush1.bf16.msra.mxu0 %v5695_v23  ;;  %3631 = vmatpush1.bf16.msra.mxu1 %v5698_v24  ;;  %v5793_v23 = vld [vmem:[%s6627_s27 + $0x844] ss:$16 sps:$4 sm:$0xff]   ;;  %v5796_v24 = vld [vmem:[%s6627_s27 + $0x84c] ss:$16 sps:$4 sm:$0xff]  }
 0x290   : > { %3374 = vmatprep.subr.bf16.mxu0 %v5703_v25  ;;  %3632 = vmatprep.subr.bf16.mxu1 %v5706_v26  ;;  %v5791_v25 = vld [vmem:[%s6627_s27 + $0x840] ss:$16 sps:$4 sm:$0xff]   ;;  %v5794_v26 = vld [vmem:[%s6627_s27 + $0x848] ss:$16 sps:$4 sm:$0xff]  }
 0x293   : > { %3375 = vmatpush1.bf16.msra.mxu0 %v5701_v30  ;;  %3633 = vmatpush1.bf16.msra.mxu1 %v5704_v33  ;;  %v5799_v30 = vld [vmem:[%s6627_s27 + $0x864] ss:$16 sps:$4 sm:$0xff]   ;;  %v5802_v33 = vld [vmem:[%s6627_s27 + $0x86c] ss:$16 sps:$4 sm:$0xff]  }
 0x294   : > { %3376 = vmatprep.subr.bf16.mxu0 %v5709_v34  ;;  %3634 = vmatprep.subr.bf16.mxu1 %v5712_v35  ;;  %v5797_v34 = vld [vmem:[%s6627_s27 + $0x860] ss:$16 sps:$4 sm:$0xff]   ;;  %v5800_v35 = vld [vmem:[%s6627_s27 + $0x868] ss:$16 sps:$4 sm:$0xff]  }
 0x297   : > { %3377 = vmatpush1.bf16.msra.mxu0 %v5707_v36  ;;  %3635 = vmatpush1.bf16.msra.mxu1 %v5710_v37  ;;  %v5805_v36 = vld [vmem:[%s6627_s27 + $0x884] ss:$16 sps:$4 sm:$0xff]   ;;  %v5808_v37 = vld [vmem:[%s6627_s27 + $0x88c] ss:$16 sps:$4 sm:$0xff]  }
 0x298   : > { %3378 = vmatprep.subr.bf16.mxu0 %v5715_v38  ;;  %3636 = vmatprep.subr.bf16.mxu1 %v5718_v39  ;;  %v5803_v38 = vld [vmem:[%s6627_s27 + $0x880] ss:$16 sps:$4 sm:$0xff]   ;;  %v5806_v39 = vld [vmem:[%s6627_s27 + $0x888] ss:$16 sps:$4 sm:$0xff]  }
 0x29b   : > { %3379 = vmatpush1.bf16.msra.mxu0 %v5713_v40  ;;  %3637 = vmatpush1.bf16.msra.mxu1 %v5716_v41  ;;  %v5811_v40 = vld [vmem:[%s6627_s27 + $0x8a4] ss:$16 sps:$4 sm:$0xff]   ;;  %v5814_v41 = vld [vmem:[%s6627_s27 + $0x8ac] ss:$16 sps:$4 sm:$0xff]  }
 0x29c   : > { %3380 = vmatprep.subr.bf16.mxu0 %v5721_v42  ;;  %3638 = vmatprep.subr.bf16.mxu1 %v5724_v28  ;;  %v5809_v42 = vld [vmem:[%s6627_s27 + $0x8a0] ss:$16 sps:$4 sm:$0xff]   ;;  %v5812_v28 = vld [vmem:[%s6627_s27 + $0x8a8] ss:$16 sps:$4 sm:$0xff]  }
 0x29f   : > { %3381 = vmatpush1.bf16.msra.mxu0 %v5719_v43  ;;  %3639 = vmatpush1.bf16.msra.mxu1 %v5722_v44  ;;  %v5817_v43 = vld [vmem:[%s6627_s27 + $0x8c4] ss:$16 sps:$4 sm:$0xff]   ;;  %v5820_v44 = vld [vmem:[%s6627_s27 + $0x8cc] ss:$16 sps:$4 sm:$0xff]  }
 0x2a0   : > { %3382 = vmatprep.subr.bf16.mxu0 %v5727_v29  ;;  %3640 = vmatprep.subr.bf16.mxu1 %v5730_v45  ;;  %v5815_v29 = vld [vmem:[%s6627_s27 + $0x8c0] ss:$16 sps:$4 sm:$0xff]   ;;  %v5818_v45 = vld [vmem:[%s6627_s27 + $0x8c8] ss:$16 sps:$4 sm:$0xff]  }
 0x2a3   : > { %3383 = vmatpush1.bf16.msra.mxu0 %v5725_v46  ;;  %3641 = vmatpush1.bf16.msra.mxu1 %v5728_v31  ;;  %v5823_v46 = vld [vmem:[%s6627_s27 + $0x8e4] ss:$16 sps:$4 sm:$0xff]   ;;  %v5826_v31 = vld [vmem:[%s6627_s27 + $0x8ec] ss:$16 sps:$4 sm:$0xff]  }
 0x2a4   : > { %3384 = vmatprep.subr.bf16.mxu0 %v5733_v47  ;;  %3642 = vmatprep.subr.bf16.mxu1 %v5736_v27  ;;  %v5821_v47 = vld [vmem:[%s6627_s27 + $0x8e0] ss:$16 sps:$4 sm:$0xff]   ;;  %v5824_v27 = vld [vmem:[%s6627_s27 + $0x8e8] ss:$16 sps:$4 sm:$0xff]  }
 0x2a7   : > { %3385 = vmatpush1.bf16.msra.mxu0 %v5731_v32  ;;  %3643 = vmatpush1.bf16.msra.mxu1 %v5734_v48  ;;  %v5829_v32 = vld [vmem:[%s6627_s27 + $0x904] ss:$16 sps:$4 sm:$0xff]   ;;  %v5832_v48 = vld [vmem:[%s6627_s27 + $0x90c] ss:$16 sps:$4 sm:$0xff]  }
 0x2a8   : > { %3386 = vmatprep.subr.bf16.mxu0 %v5739_v49  ;;  %3644 = vmatprep.subr.bf16.mxu1 %v5742_v50  ;;  %v5827_v49 = vld [vmem:[%s6627_s27 + $0x900] ss:$16 sps:$4 sm:$0xff]   ;;  %v5830_v50 = vld [vmem:[%s6627_s27 + $0x908] ss:$16 sps:$4 sm:$0xff]  }
 0x2ab   : > { %3387 = vmatpush1.bf16.msra.mxu0 %v5737_v51  ;;  %3645 = vmatpush1.bf16.msra.mxu1 %v5740_v52  ;;  %v5835_v51 = vld [vmem:[%s6627_s27 + $0x924] ss:$16 sps:$4 sm:$0xff]   ;;  %v5838_v52 = vld [vmem:[%s6627_s27 + $0x92c] ss:$16 sps:$4 sm:$0xff]  }
 0x2ac   : > { %3388 = vmatprep.subr.bf16.mxu0 %v5745_v53  ;;  %3646 = vmatprep.subr.bf16.mxu1 %v5748_v54  ;;  %v5833_v53 = vld [vmem:[%s6627_s27 + $0x920] ss:$16 sps:$4 sm:$0xff]   ;;  %v5836_v54 = vld [vmem:[%s6627_s27 + $0x928] ss:$16 sps:$4 sm:$0xff]  }
 0x2af   : > { %3389 = vmatpush1.bf16.msra.mxu0 %v5743_v55  ;;  %3647 = vmatpush1.bf16.msra.mxu1 %v5746_v56  ;;  %v5841_v55 = vld [vmem:[%s6627_s27 + $0x944] ss:$16 sps:$4 sm:$0xff]   ;;  %v5844_v56 = vld [vmem:[%s6627_s27 + $0x94c] ss:$16 sps:$4 sm:$0xff]  }
 0x2b0   : > { %3390 = vmatprep.subr.bf16.mxu0 %v5751_v57  ;;  %3648 = vmatprep.subr.bf16.mxu1 %v5754_v58  ;;  %v5839_v57 = vld [vmem:[%s6627_s27 + $0x940] ss:$16 sps:$4 sm:$0xff]   ;;  %v5842_v58 = vld [vmem:[%s6627_s27 + $0x948] ss:$16 sps:$4 sm:$0xff]  }
 0x2b3   : > { %3391 = vmatpush1.bf16.msra.mxu0 %v5749_v59  ;;  %3649 = vmatpush1.bf16.msra.mxu1 %v5752_v60  ;;  %v5847_v59 = vld [vmem:[%s6627_s27 + $0x964] ss:$16 sps:$4 sm:$0xff]   ;;  %v5850_v60 = vld [vmem:[%s6627_s27 + $0x96c] ss:$16 sps:$4 sm:$0xff]  }
 0x2b4   : > { %3392 = vmatprep.subr.bf16.mxu0 %v5757_v61  ;;  %3650 = vmatprep.subr.bf16.mxu1 %v5760_v62  ;;  %v5845_v61 = vld [vmem:[%s6627_s27 + $0x960] ss:$16 sps:$4 sm:$0xff]   ;;  %v5848_v62 = vld [vmem:[%s6627_s27 + $0x968] ss:$16 sps:$4 sm:$0xff]  }
 0x2b7   : > { %3393 = vmatpush1.bf16.msra.mxu0 %v5755_v63  ;;  %3651 = vmatpush1.bf16.msra.mxu1 %v5758_v0  ;;  %v5853_v63 = vld [vmem:[%s6627_s27 + $0x984] ss:$16 sps:$4 sm:$0xff]   ;;  %v5856_v0 = vld [vmem:[%s6627_s27 + $0x98c] ss:$16 sps:$4 sm:$0xff]  }
 0x2b8   : > { %3394 = vmatprep.subr.bf16.mxu0 %v5763_v1  ;;  %3652 = vmatprep.subr.bf16.mxu1 %v5766_v2  ;;  %v5851_v1 = vld [vmem:[%s6627_s27 + $0x980] ss:$16 sps:$4 sm:$0xff]   ;;  %v5854_v2 = vld [vmem:[%s6627_s27 + $0x988] ss:$16 sps:$4 sm:$0xff]  }
 0x2bb   : > { %3395 = vmatpush1.bf16.msra.mxu0 %v5761_v3  ;;  %3653 = vmatpush1.bf16.msra.mxu1 %v5764_v4  ;;  %v5859_v3 = vld [vmem:[%s6627_s27 + $0x9a4] ss:$16 sps:$4 sm:$0xff]   ;;  %v5862_v4 = vld [vmem:[%s6627_s27 + $0x9ac] ss:$16 sps:$4 sm:$0xff]  }
 0x2bc   : > { %3396 = vmatprep.subr.bf16.mxu0 %v5769_v5  ;;  %3654 = vmatprep.subr.bf16.mxu1 %v5772_v6  ;;  %v5857_v5 = vld [vmem:[%s6627_s27 + $0x9a0] ss:$16 sps:$4 sm:$0xff]   ;;  %v5860_v6 = vld [vmem:[%s6627_s27 + $0x9a8] ss:$16 sps:$4 sm:$0xff]  }
 0x2bf   : > { %3397 = vmatpush1.bf16.msra.mxu0 %v5767_v7  ;;  %3655 = vmatpush1.bf16.msra.mxu1 %v5770_v8  ;;  %v5865_v7 = vld [vmem:[%s6627_s27 + $0x9c4] ss:$16 sps:$4 sm:$0xff]   ;;  %v5868_v8 = vld [vmem:[%s6627_s27 + $0x9cc] ss:$16 sps:$4 sm:$0xff]  }
 0x2c0   : > { %3398 = vmatprep.subr.bf16.mxu0 %v5775_v9  ;;  %3656 = vmatprep.subr.bf16.mxu1 %v5778_v10  ;;  %v5863_v9 = vld [vmem:[%s6627_s27 + $0x9c0] ss:$16 sps:$4 sm:$0xff]   ;;  %v5866_v10 = vld [vmem:[%s6627_s27 + $0x9c8] ss:$16 sps:$4 sm:$0xff]  }
 0x2c3   : > { %3399 = vmatpush1.bf16.msra.mxu0 %v5773_v11  ;;  %3657 = vmatpush1.bf16.msra.mxu1 %v5776_v12  ;;  %v5871_v11 = vld [vmem:[%s6627_s27 + $0x9e4] ss:$16 sps:$4 sm:$0xff]   ;;  %v5874_v12 = vld [vmem:[%s6627_s27 + $0x9ec] ss:$16 sps:$4 sm:$0xff]  }
 0x2c4   : > { %3411 = vmatprep.subr.bf16.mxu0 %v5781_v13  ;;  %3669 = vmatprep.subr.bf16.mxu1 %v5784_v14  ;;  %v5869_v13 = vld [vmem:[%s6627_s27 + $0x9e0] ss:$16 sps:$4 sm:$0xff]   ;;  %v5872_v14 = vld [vmem:[%s6627_s27 + $0x9e8] ss:$16 sps:$4 sm:$0xff]  }
 0x2c6   : > { %3401 = vmatmul.mubr.bf16.vlgmr.msra.gmra.mrb[0].mxu0 %v905_v17  ;;  %3659 = vmatmul.mubr.bf16.vlgmr.msra.gmra.mrb[0].mxu1 %v905_v17  ;;  %v5875_v17 = vld [vmem:[%s6627_s27 + $0xa00] ss:$16 sps:$4 sm:$0xff]  }
 0x2c7   : > { %3412 = vmatpush1.bf16.msra.mxu0 %v5779_v15  ;;  %3670 = vmatpush1.bf16.msra.mxu1 %v5782_v16  ;;  %v5877_v15 = vld [vmem:[%s6627_s27 + $0xa04] ss:$16 sps:$4 sm:$0xff]   ;;  %v5880_v16 = vld [vmem:[%s6627_s27 + $0xa0c] ss:$16 sps:$4 sm:$0xff]  }
 0x2c8   : > { %3413 = vmatprep.subr.bf16.mxu0 %v5787_v18  ;;  %3671 = vmatprep.subr.bf16.mxu1 %v5790_v19  ;;  %v5878_v18 = vld [vmem:[%s6627_s27 + $0xa08] ss:$16 sps:$4 sm:$0xff]   ;;  %v907_v19 = vld [vmem:[#allocation2 + $0x40] sm:$0xff] }
 0x2c9   : > { %3443 = vmatprep.mubr.bf16.mxu0 %v908_v20  ;;  %3701 = vmatprep.mubr.bf16.mxu1 %v908_v20  ;;  %v5883_v20 = vld [vmem:[%s6627_s27 + $0xa24] ss:$16 sps:$4 sm:$0xff]  }
 0x2cb   : > { %3414 = vmatpush1.bf16.msra.mxu0 %v5785_v21  ;;  %3672 = vmatpush1.bf16.msra.mxu1 %v5788_v22  ;;  %v5886_v21 = vld [vmem:[%s6627_s27 + $0xa2c] ss:$16 sps:$4 sm:$0xff]   ;;  %v910_v22 = vld [vmem:[#allocation2 + $0x58] sm:$0xff] }
 0x2cc   : > { %3415 = vmatprep.subr.bf16.mxu0 %v5793_v23  ;;  %3673 = vmatprep.subr.bf16.mxu1 %v5796_v24  ;;  %v5881_v23 = vld [vmem:[%s6627_s27 + $0xa20] ss:$16 sps:$4 sm:$0xff]   ;;  %v5884_v24 = vld [vmem:[%s6627_s27 + $0xa28] ss:$16 sps:$4 sm:$0xff]  }
 0x2cf   : > { %3416 = vmatpush1.bf16.msra.mxu0 %v5791_v25  ;;  %3674 = vmatpush1.bf16.msra.mxu1 %v5794_v26  ;;  %v5889_v25 = vld [vmem:[%s6627_s27 + $0xa44] ss:$16 sps:$4 sm:$0xff]   ;;  %v5892_v26 = vld [vmem:[%s6627_s27 + $0xa4c] ss:$16 sps:$4 sm:$0xff]  }
 0x2d0   : > { %3417 = vmatprep.subr.bf16.mxu0 %v5799_v30  ;;  %3675 = vmatprep.subr.bf16.mxu1 %v5802_v33  ;;  %v5887_v30 = vld [vmem:[%s6627_s27 + $0xa40] ss:$16 sps:$4 sm:$0xff]   ;;  %v5890_v33 = vld [vmem:[%s6627_s27 + $0xa48] ss:$16 sps:$4 sm:$0xff]  }
 0x2d3   : > { %3418 = vmatpush1.bf16.msra.mxu0 %v5797_v34  ;;  %3676 = vmatpush1.bf16.msra.mxu1 %v5800_v35  ;;  %v5895_v34 = vld [vmem:[%s6627_s27 + $0xa64] ss:$16 sps:$4 sm:$0xff]   ;;  %v5898_v35 = vld [vmem:[%s6627_s27 + $0xa6c] ss:$16 sps:$4 sm:$0xff]  }
 0x2d4   : > { %3419 = vmatprep.subr.bf16.mxu0 %v5805_v36  ;;  %3677 = vmatprep.subr.bf16.mxu1 %v5808_v37  ;;  %v5893_v36 = vld [vmem:[%s6627_s27 + $0xa60] ss:$16 sps:$4 sm:$0xff]   ;;  %v5896_v37 = vld [vmem:[%s6627_s27 + $0xa68] ss:$16 sps:$4 sm:$0xff]  }
 0x2d7   : > { %3420 = vmatpush1.bf16.msra.mxu0 %v5803_v38  ;;  %3678 = vmatpush1.bf16.msra.mxu1 %v5806_v39  ;;  %v5901_v38 = vld [vmem:[%s6627_s27 + $0xa84] ss:$16 sps:$4 sm:$0xff]   ;;  %v5904_v39 = vld [vmem:[%s6627_s27 + $0xa8c] ss:$16 sps:$4 sm:$0xff]  }
 0x2d8   : > { %3421 = vmatprep.subr.bf16.mxu0 %v5811_v40  ;;  %3679 = vmatprep.subr.bf16.mxu1 %v5814_v41  ;;  %v5899_v40 = vld [vmem:[%s6627_s27 + $0xa80] ss:$16 sps:$4 sm:$0xff]   ;;  %v5902_v41 = vld [vmem:[%s6627_s27 + $0xa88] ss:$16 sps:$4 sm:$0xff]  }
 0x2db   : > { %3422 = vmatpush1.bf16.msra.mxu0 %v5809_v42  ;;  %3680 = vmatpush1.bf16.msra.mxu1 %v5812_v28  ;;  %v5907_v42 = vld [vmem:[%s6627_s27 + $0xaa4] ss:$16 sps:$4 sm:$0xff]   ;;  %v5910_v28 = vld [vmem:[%s6627_s27 + $0xaac] ss:$16 sps:$4 sm:$0xff]  }
 0x2dc   : > { %3423 = vmatprep.subr.bf16.mxu0 %v5817_v43  ;;  %3681 = vmatprep.subr.bf16.mxu1 %v5820_v44  ;;  %v5905_v43 = vld [vmem:[%s6627_s27 + $0xaa0] ss:$16 sps:$4 sm:$0xff]   ;;  %v5908_v44 = vld [vmem:[%s6627_s27 + $0xaa8] ss:$16 sps:$4 sm:$0xff]  }
 0x2df   : > { %3424 = vmatpush1.bf16.msra.mxu0 %v5815_v29  ;;  %3682 = vmatpush1.bf16.msra.mxu1 %v5818_v45  ;;  %v5913_v29 = vld [vmem:[%s6627_s27 + $0xac4] ss:$16 sps:$4 sm:$0xff]   ;;  %v5916_v45 = vld [vmem:[%s6627_s27 + $0xacc] ss:$16 sps:$4 sm:$0xff]  }
 0x2e0   : > { %3425 = vmatprep.subr.bf16.mxu0 %v5823_v46  ;;  %3683 = vmatprep.subr.bf16.mxu1 %v5826_v31  ;;  %v5911_v46 = vld [vmem:[%s6627_s27 + $0xac0] ss:$16 sps:$4 sm:$0xff]   ;;  %v5914_v31 = vld [vmem:[%s6627_s27 + $0xac8] ss:$16 sps:$4 sm:$0xff]  }
 0x2e3   : > { %3426 = vmatpush1.bf16.msra.mxu0 %v5821_v47  ;;  %3684 = vmatpush1.bf16.msra.mxu1 %v5824_v27  ;;  %v5919_v47 = vld [vmem:[%s6627_s27 + $0xae4] ss:$16 sps:$4 sm:$0xff]   ;;  %v5922_v27 = vld [vmem:[%s6627_s27 + $0xaec] ss:$16 sps:$4 sm:$0xff]  }
 0x2e4   : > { %3427 = vmatprep.subr.bf16.mxu0 %v5829_v32  ;;  %3685 = vmatprep.subr.bf16.mxu1 %v5832_v48  ;;  %v5917_v32 = vld [vmem:[%s6627_s27 + $0xae0] ss:$16 sps:$4 sm:$0xff]   ;;  %v5920_v48 = vld [vmem:[%s6627_s27 + $0xae8] ss:$16 sps:$4 sm:$0xff]  }
 0x2e7   : > { %3428 = vmatpush1.bf16.msra.mxu0 %v5827_v49  ;;  %3686 = vmatpush1.bf16.msra.mxu1 %v5830_v50  ;;  %v5925_v49 = vld [vmem:[%s6627_s27 + $0xb04] ss:$16 sps:$4 sm:$0xff]   ;;  %v5928_v50 = vld [vmem:[%s6627_s27 + $0xb0c] ss:$16 sps:$4 sm:$0xff]  }
 0x2e8   : > { %3429 = vmatprep.subr.bf16.mxu0 %v5835_v51  ;;  %3687 = vmatprep.subr.bf16.mxu1 %v5838_v52  ;;  %v5923_v51 = vld [vmem:[%s6627_s27 + $0xb00] ss:$16 sps:$4 sm:$0xff]   ;;  %v5926_v52 = vld [vmem:[%s6627_s27 + $0xb08] ss:$16 sps:$4 sm:$0xff]  }
 0x2eb   : > { %3430 = vmatpush1.bf16.msra.mxu0 %v5833_v53  ;;  %3688 = vmatpush1.bf16.msra.mxu1 %v5836_v54  ;;  %v5931_v53 = vld [vmem:[%s6627_s27 + $0xb24] ss:$16 sps:$4 sm:$0xff]   ;;  %v5934_v54 = vld [vmem:[%s6627_s27 + $0xb2c] ss:$16 sps:$4 sm:$0xff]  }
 0x2ec   : > { %3431 = vmatprep.subr.bf16.mxu0 %v5841_v55  ;;  %3689 = vmatprep.subr.bf16.mxu1 %v5844_v56  ;;  %v5929_v55 = vld [vmem:[%s6627_s27 + $0xb20] ss:$16 sps:$4 sm:$0xff]   ;;  %v5932_v56 = vld [vmem:[%s6627_s27 + $0xb28] ss:$16 sps:$4 sm:$0xff]  }
 0x2ef   : > { %3432 = vmatpush1.bf16.msra.mxu0 %v5839_v57  ;;  %3690 = vmatpush1.bf16.msra.mxu1 %v5842_v58  ;;  %v5937_v57 = vld [vmem:[%s6627_s27 + $0xb44] ss:$16 sps:$4 sm:$0xff]   ;;  %v5940_v58 = vld [vmem:[%s6627_s27 + $0xb4c] ss:$16 sps:$4 sm:$0xff]  }
 0x2f0   : > { %3433 = vmatprep.subr.bf16.mxu0 %v5847_v59  ;;  %3691 = vmatprep.subr.bf16.mxu1 %v5850_v60  ;;  %v5935_v59 = vld [vmem:[%s6627_s27 + $0xb40] ss:$16 sps:$4 sm:$0xff]   ;;  %v5938_v60 = vld [vmem:[%s6627_s27 + $0xb48] ss:$16 sps:$4 sm:$0xff]  }
 0x2f3   : > { %3434 = vmatpush1.bf16.msra.mxu0 %v5845_v61  ;;  %3692 = vmatpush1.bf16.msra.mxu1 %v5848_v62  ;;  %v5943_v61 = vld [vmem:[%s6627_s27 + $0xb64] ss:$16 sps:$4 sm:$0xff]   ;;  %v5946_v62 = vld [vmem:[%s6627_s27 + $0xb6c] ss:$16 sps:$4 sm:$0xff]  }
 0x2f4   : > { %3435 = vmatprep.subr.bf16.mxu0 %v5853_v63  ;;  %3693 = vmatprep.subr.bf16.mxu1 %v5856_v0  ;;  %v5941_v63 = vld [vmem:[%s6627_s27 + $0xb60] ss:$16 sps:$4 sm:$0xff]   ;;  %v5944_v0 = vld [vmem:[%s6627_s27 + $0xb68] ss:$16 sps:$4 sm:$0xff]  }
 0x2f7   : > { %3436 = vmatpush1.bf16.msra.mxu0 %v5851_v1  ;;  %3694 = vmatpush1.bf16.msra.mxu1 %v5854_v2  ;;  %v5949_v1 = vld [vmem:[%s6627_s27 + $0xb84] ss:$16 sps:$4 sm:$0xff]   ;;  %v5952_v2 = vld [vmem:[%s6627_s27 + $0xb8c] ss:$16 sps:$4 sm:$0xff]  }
 0x2f8   : > { %3437 = vmatprep.subr.bf16.mxu0 %v5859_v3  ;;  %3695 = vmatprep.subr.bf16.mxu1 %v5862_v4  ;;  %v5947_v3 = vld [vmem:[%s6627_s27 + $0xb80] ss:$16 sps:$4 sm:$0xff]   ;;  %v5950_v4 = vld [vmem:[%s6627_s27 + $0xb88] ss:$16 sps:$4 sm:$0xff]  }
 0x2fb   : > { %3438 = vmatpush1.bf16.msra.mxu0 %v5857_v5  ;;  %3696 = vmatpush1.bf16.msra.mxu1 %v5860_v6  ;;  %v5955_v5 = vld [vmem:[%s6627_s27 + $0xba4] ss:$16 sps:$4 sm:$0xff]   ;;  %v5958_v6 = vld [vmem:[%s6627_s27 + $0xbac] ss:$16 sps:$4 sm:$0xff]  }
 0x2fc   : > { %3439 = vmatprep.subr.bf16.mxu0 %v5865_v7  ;;  %3697 = vmatprep.subr.bf16.mxu1 %v5868_v8  ;;  %v5953_v7 = vld [vmem:[%s6627_s27 + $0xba0] ss:$16 sps:$4 sm:$0xff]   ;;  %v5956_v8 = vld [vmem:[%s6627_s27 + $0xba8] ss:$16 sps:$4 sm:$0xff]  }
 0x2ff   : > { %3440 = vmatpush1.bf16.msra.mxu0 %v5863_v9  ;;  %3698 = vmatpush1.bf16.msra.mxu1 %v5866_v10  ;;  %v5961_v9 = vld [vmem:[%s6627_s27 + $0xbc4] ss:$16 sps:$4 sm:$0xff]   ;;  %v5964_v10 = vld [vmem:[%s6627_s27 + $0xbcc] ss:$16 sps:$4 sm:$0xff]  }
 0x300   : > { %3441 = vmatprep.subr.bf16.mxu0 %v5871_v11  ;;  %3699 = vmatprep.subr.bf16.mxu1 %v5874_v12  ;;  %v5959_v11 = vld [vmem:[%s6627_s27 + $0xbc0] ss:$16 sps:$4 sm:$0xff]   ;;  %v5962_v12 = vld [vmem:[%s6627_s27 + $0xbc8] ss:$16 sps:$4 sm:$0xff]  }
 0x303   : > { %3442 = vmatpush1.bf16.msra.mxu0 %v5869_v13  ;;  %3700 = vmatpush1.bf16.msra.mxu1 %v5872_v14  ;;  %v5967_v13 = vld [vmem:[%s6627_s27 + $0xbe4] ss:$16 sps:$4 sm:$0xff]   ;;  %v5970_v14 = vld [vmem:[%s6627_s27 + $0xbec] ss:$16 sps:$4 sm:$0xff]  }
 0x304   : > { %3454 = vmatprep.subr.bf16.mxu0 %v5877_v15  ;;  %3712 = vmatprep.subr.bf16.mxu1 %v5880_v16  ;;  %v5965_v15 = vld [vmem:[%s6627_s27 + $0xbe0] ss:$16 sps:$4 sm:$0xff]   ;;  %v5968_v16 = vld [vmem:[%s6627_s27 + $0xbe8] ss:$16 sps:$4 sm:$0xff]  }
 0x306   : > { %3444 = vmatmul.mubr.bf16.vlgmr.msra.gmra.mrb[0].mxu0 %v907_v19  ;;  %3702 = vmatmul.mubr.bf16.vlgmr.msra.gmra.mrb[0].mxu1 %v907_v19 }
 0x307   : > { %3455 = vmatpush1.bf16.msra.mxu0 %v5875_v17  ;;  %3713 = vmatpush1.bf16.msra.mxu1 %v5878_v18  ;;  %v909_v17 = vld [vmem:[#allocation2 + $0x50] sm:$0xff]  ;;  %v1299_v18 = vlaneseq }
 0x308   : > { %3456 = vmatprep.subr.bf16.mxu0 %v5883_v20  ;;  %3714 = vmatprep.subr.bf16.mxu1 %v5886_v21 }
 0x309   : > { %3486 = vmatprep.mubr.bf16.mxu0 %v910_v22  ;;  %3744 = vmatprep.mubr.bf16.mxu1 %v910_v22  ;;  %v1300_v19 = vshrl.u32 %v1299_v18, 7  ;;  %v1297_v22 = vld [vmem:[%s1296_s21] sm:$0xf]  ;;  %v5996_v18 = vld [vmem:[#allocation13 + $0x1f0] sm:$0xff] (!%p5031_p2)  }
 0x30b   : > { %3457 = vmatpush1.bf16.msra.mxu0 %v5881_v23  ;;  %3715 = vmatpush1.bf16.msra.mxu1 %v5884_v24  ;;  %v1301_v20 = vsub.s32 0, %v1300_v19  ;;  %v1309_v21 = vsub.s32 2, %v1300_v19  ;;  %v1305_v23 = vsub.s32 1, %v1300_v19  ;;  %v1313_v24 = vsub.s32 3, %v1300_v19  ;;  %v5997_v19 = vld [vmem:[#allocation13 + $0x130] sm:$0xff] (!%p5031_p2)  }
 0x30c   : > { %3458 = vmatprep.subr.bf16.mxu0 %v5889_v25  ;;  %3716 = vmatprep.subr.bf16.mxu1 %v5892_v26 }
 0x30d   : > { %v1302_v25 = vrot.slane %v1297_v22, %v1301_v20  ;;  %v1310_v26 = vrot.slane %v1297_v22, %v1309_v21  ;;  %v5998_v20 = vld [vmem:[#allocation13 + $0x1b0] sm:$0xff] (!%p5031_p2)   ;;  %v5999_v21 = vld [vmem:[#allocation13 + $0x178] sm:$0xff] (!%p5031_p2)  }
 0x30f   : > { %3459 = vmatpush1.bf16.msra.mxu0 %v5887_v30  ;;  %3717 = vmatpush1.bf16.msra.mxu1 %v5890_v33  ;;  %v1306_v30 = vrot.slane %v1297_v22, %v1305_v23  ;;  %v1314_v33 = vrot.slane %v1297_v22, %v1313_v24  ;;  %v6000_v22 = vld [vmem:[#allocation13 + $0x1f8] sm:$0xff] (!%p5031_p2)  }
 0x310   : > { %3460 = vmatprep.subr.bf16.mxu0 %v5895_v34  ;;  %3718 = vmatprep.subr.bf16.mxu1 %v5898_v35  ;;  %v6001_v23 = vld [vmem:[#allocation13 + $0x138] sm:$0xff] (!%p5031_p2)  }
 0x311   : > { %v6002_v24 = vld [vmem:[#allocation13 + $0x1b8] sm:$0xff] (!%p5031_p2)  }
 0x313   : > { %3461 = vmatpush1.bf16.msra.mxu0 %v5893_v36  ;;  %3719 = vmatpush1.bf16.msra.mxu1 %v5896_v37 }
 0x314   : > { %3462 = vmatprep.subr.bf16.mxu0 %v5901_v38  ;;  %3720 = vmatprep.subr.bf16.mxu1 %v5904_v39 }
 0x317   : > { %3463 = vmatpush1.bf16.msra.mxu0 %v5899_v40  ;;  %3721 = vmatpush1.bf16.msra.mxu1 %v5902_v41 }
 0x318   : > { %3464 = vmatprep.subr.bf16.mxu0 %v5907_v42  ;;  %3722 = vmatprep.subr.bf16.mxu1 %v5910_v28 }
 0x31b   : > { %3465 = vmatpush1.bf16.msra.mxu0 %v5905_v43  ;;  %3723 = vmatpush1.bf16.msra.mxu1 %v5908_v44 }
 0x31c   : > { %3466 = vmatprep.subr.bf16.mxu0 %v5913_v29  ;;  %3724 = vmatprep.subr.bf16.mxu1 %v5916_v45 }
 0x31f   : > { %3467 = vmatpush1.bf16.msra.mxu0 %v5911_v46  ;;  %3725 = vmatpush1.bf16.msra.mxu1 %v5914_v31 }
 0x320   : > { %3468 = vmatprep.subr.bf16.mxu0 %v5919_v47  ;;  %3726 = vmatprep.subr.bf16.mxu1 %v5922_v27 }
 0x323   : > { %3469 = vmatpush1.bf16.msra.mxu0 %v5917_v32  ;;  %3727 = vmatpush1.bf16.msra.mxu1 %v5920_v48 }
 0x324   : > { %3470 = vmatprep.subr.bf16.mxu0 %v5925_v49  ;;  %3728 = vmatprep.subr.bf16.mxu1 %v5928_v50 }
 0x327   : > { %3471 = vmatpush1.bf16.msra.mxu0 %v5923_v51  ;;  %3729 = vmatpush1.bf16.msra.mxu1 %v5926_v52 }
 0x328   : > { %3472 = vmatprep.subr.bf16.mxu0 %v5931_v53  ;;  %3730 = vmatprep.subr.bf16.mxu1 %v5934_v54 }
 0x32b   : > { %3473 = vmatpush1.bf16.msra.mxu0 %v5929_v55  ;;  %3731 = vmatpush1.bf16.msra.mxu1 %v5932_v56 }
 0x32c   : > { %3474 = vmatprep.subr.bf16.mxu0 %v5937_v57  ;;  %3732 = vmatprep.subr.bf16.mxu1 %v5940_v58  ;;  %v5971_v57 = vld [vmem:[#allocation13 + $0x140] sm:$0xff] (!%p5031_p2)  }
 0x32d   : > { %v5972_v58 = vld [vmem:[#allocation13 + $0x1c0] sm:$0xff] (!%p5031_p2)  }
 0x32f   : > { %3475 = vmatpush1.bf16.msra.mxu0 %v5935_v59  ;;  %3733 = vmatpush1.bf16.msra.mxu1 %v5938_v60  ;;  %v5973_v59 = vld [vmem:[#allocation13 + $0x100] sm:$0xff] (!%p5031_p2)  }
 0x330   : > { %3476 = vmatprep.subr.bf16.mxu0 %v5943_v61  ;;  %3734 = vmatprep.subr.bf16.mxu1 %v5946_v62  ;;  %v5974_v60 = vld [vmem:[#allocation13 + $0x180] sm:$0xff] (!%p5031_p2)   ;;  %v5975_v61 = vld [vmem:[#allocation13 + $0x148] sm:$0xff] (!%p5031_p2)  }
 0x331   : > { %v5976_v62 = vld [vmem:[#allocation13 + $0x1c8] sm:$0xff] (!%p5031_p2)  }
 0x333   : > { %3477 = vmatpush1.bf16.msra.mxu0 %v5941_v63  ;;  %3735 = vmatpush1.bf16.msra.mxu1 %v5944_v0  ;;  %v5977_v63 = vld [vmem:[#allocation13 + $0x108] sm:$0xff] (!%p5031_p2)  }
 0x334   : > { %3478 = vmatprep.subr.bf16.mxu0 %v5949_v1  ;;  %3736 = vmatprep.subr.bf16.mxu1 %v5952_v2  ;;  %v5978_v0 = vld [vmem:[#allocation13 + $0x188] sm:$0xff] (!%p5031_p2)   ;;  %v5979_v1 = vld [vmem:[#allocation13 + $0x150] sm:$0xff] (!%p5031_p2)  }
 0x335   : > { %v5980_v2 = vld [vmem:[#allocation13 + $0x1d0] sm:$0xff] (!%p5031_p2)  }
 0x337   : > { %3479 = vmatpush1.bf16.msra.mxu0 %v5947_v3  ;;  %3737 = vmatpush1.bf16.msra.mxu1 %v5950_v4  ;;  %v5981_v3 = vld [vmem:[#allocation13 + $0x110] sm:$0xff] (!%p5031_p2)  }
 0x338   : > { %3480 = vmatprep.subr.bf16.mxu0 %v5955_v5  ;;  %3738 = vmatprep.subr.bf16.mxu1 %v5958_v6  ;;  %v5982_v4 = vld [vmem:[#allocation13 + $0x190] sm:$0xff] (!%p5031_p2)   ;;  %v5983_v5 = vld [vmem:[#allocation13 + $0x158] sm:$0xff] (!%p5031_p2)  }
 0x339   : > { %v5984_v6 = vld [vmem:[#allocation13 + $0x1d8] sm:$0xff] (!%p5031_p2)  }
 0x33b   : > { %3481 = vmatpush1.bf16.msra.mxu0 %v5953_v7  ;;  %3739 = vmatpush1.bf16.msra.mxu1 %v5956_v8  ;;  %v5985_v7 = vld [vmem:[#allocation13 + $0x118] sm:$0xff] (!%p5031_p2)  }
 0x33c   : > { %3482 = vmatprep.subr.bf16.mxu0 %v5961_v9  ;;  %3740 = vmatprep.subr.bf16.mxu1 %v5964_v10  ;;  %v5986_v8 = vld [vmem:[#allocation13 + $0x198] sm:$0xff] (!%p5031_p2)   ;;  %v5987_v9 = vld [vmem:[#allocation13 + $0x160] sm:$0xff] (!%p5031_p2)  }
 0x33d   : > { %v5988_v10 = vld [vmem:[#allocation13 + $0x1e0] sm:$0xff] (!%p5031_p2)  }
 0x33f   : > { %3483 = vmatpush1.bf16.msra.mxu0 %v5959_v11  ;;  %3741 = vmatpush1.bf16.msra.mxu1 %v5962_v12  ;;  %v5989_v11 = vld [vmem:[#allocation13 + $0x120] sm:$0xff] (!%p5031_p2)  }
 0x340   : > { %3484 = vmatprep.subr.bf16.mxu0 %v5967_v13  ;;  %3742 = vmatprep.subr.bf16.mxu1 %v5970_v14  ;;  %v5990_v12 = vld [vmem:[#allocation13 + $0x1a0] sm:$0xff] (!%p5031_p2)   ;;  %v5991_v13 = vld [vmem:[#allocation13 + $0x168] sm:$0xff] (!%p5031_p2)  }
 0x341   : > { %v5992_v14 = vld [vmem:[#allocation13 + $0x1e8] sm:$0xff] (!%p5031_p2)  }
 0x343   : > { %3485 = vmatpush1.bf16.msra.mxu0 %v5965_v15  ;;  %3743 = vmatpush1.bf16.msra.mxu1 %v5968_v16  ;;  %v5993_v15 = vld [vmem:[#allocation13 + $0x128] sm:$0xff] (!%p5031_p2)  }
 0x344   : > { %5103 = vmatprep.subr.bf16.mxu0 (!%p5031_p2), %v5971_v57  ;;  %5125 = vmatprep.subr.bf16.mxu1 (!%p5031_p2), %v5972_v58  ;;  %v5994_v16 = vld [vmem:[#allocation13 + $0x1a8] sm:$0xff] (!%p5031_p2)   ;;  %v6031_v57 = vld [vmem:[#allocation13 + $0x78] sm:$0xff] (!%p5031_p2)  }
 0x345   : > { %v6032_v58 = vld [vmem:[#allocation13 + $0xf8] sm:$0xff] (!%p5031_p2)  }
 0x346   : > { %3487 = vmatmul.mubr.bf16.vlgmr.msra.gmra.mrb[0].mxu0 %v909_v17  ;;  %3745 = vmatmul.mubr.bf16.vlgmr.msra.gmra.mrb[0].mxu1 %v909_v17  ;;  %v5995_v17 = vld [vmem:[#allocation13 + $0x170] sm:$0xff] (!%p5031_p2)  }
 0x347   : > { %5104 = vmatpush3.bf16.msra.mxu0 (!%p5031_p2), %v5973_v59  ;;  %5126 = vmatpush3.bf16.msra.mxu1 (!%p5031_p2), %v5974_v60  ;;  %v6033_v59 = vld [vmem:[#allocation13 + $0x38] sm:$0xff] (!%p5031_p2)  }
 0x348   : > { %5105 = vmatprep.subr.bf16.mxu0 (!%p5031_p2), %v5975_v61  ;;  %5127 = vmatprep.subr.bf16.mxu1 (!%p5031_p2), %v5976_v62  ;;  %v6034_v60 = vld [vmem:[#allocation13 + $0xb8] sm:$0xff] (!%p5031_p2)  }
 0x34b   : > { %5106 = vmatpush3.bf16.msra.mxu0 (!%p5031_p2), %v5977_v63  ;;  %5128 = vmatpush3.bf16.msra.mxu1 (!%p5031_p2), %v5978_v0 }
 0x34c   : > { %5107 = vmatprep.subr.bf16.mxu0 (!%p5031_p2), %v5979_v1  ;;  %5129 = vmatprep.subr.bf16.mxu1 (!%p5031_p2), %v5980_v2 }
 0x34f   : > { %5108 = vmatpush3.bf16.msra.mxu0 (!%p5031_p2), %v5981_v3  ;;  %5130 = vmatpush3.bf16.msra.mxu1 (!%p5031_p2), %v5982_v4 }
 0x350   : > { %5109 = vmatprep.subr.bf16.mxu0 (!%p5031_p2), %v5983_v5  ;;  %5131 = vmatprep.subr.bf16.mxu1 (!%p5031_p2), %v5984_v6 }
 0x353   : > { %5110 = vmatpush3.bf16.msra.mxu0 (!%p5031_p2), %v5985_v7  ;;  %5132 = vmatpush3.bf16.msra.mxu1 (!%p5031_p2), %v5986_v8 }
 0x354   : > { %5111 = vmatprep.subr.bf16.mxu0 (!%p5031_p2), %v5987_v9  ;;  %5133 = vmatprep.subr.bf16.mxu1 (!%p5031_p2), %v5988_v10 }
 0x357   : > { %5112 = vmatpush3.bf16.msra.mxu0 (!%p5031_p2), %v5989_v11  ;;  %5134 = vmatpush3.bf16.msra.mxu1 (!%p5031_p2), %v5990_v12 }
 0x358   : > { %5113 = vmatprep.subr.bf16.mxu0 (!%p5031_p2), %v5991_v13  ;;  %5135 = vmatprep.subr.bf16.mxu1 (!%p5031_p2), %v5992_v14 }
 0x35b   : > { %5114 = vmatpush3.bf16.msra.mxu0 (!%p5031_p2), %v5993_v15  ;;  %5136 = vmatpush3.bf16.msra.mxu1 (!%p5031_p2), %v5994_v16 }
 0x35c   : > { %5115 = vmatprep.subr.bf16.mxu0 (!%p5031_p2), %v5995_v17  ;;  %5137 = vmatprep.subr.bf16.mxu1 (!%p5031_p2), %v5996_v18 }
 0x35f   : > { %5116 = vmatpush3.bf16.msra.mxu0 (!%p5031_p2), %v5997_v19  ;;  %5138 = vmatpush3.bf16.msra.mxu1 (!%p5031_p2), %v5998_v20 }
 0x360   : > { %5117 = vmatprep.subr.bf16.mxu0 (!%p5031_p2), %v5999_v21  ;;  %5139 = vmatprep.subr.bf16.mxu1 (!%p5031_p2), %v6000_v22 }
 0x363   : > { %5118 = vmatpush3.bf16.msra.mxu0 (!%p5031_p2), %v6001_v23  ;;  %5140 = vmatpush3.bf16.msra.mxu1 (!%p5031_p2), %v6002_v24 }
 0x419   : > { %v3488_v34 = vpop.f32.mrb[0].mxu0  ;;  %v3746_v35 = vpop.f32.mrb[0].mxu1 }
 0x41a   : > { %v5191_v36 = vadd.f32 %v3488_v34, %v1302_v25  ;;  %v5195_v37 = vadd.f32 %v3746_v35, %v1310_v26  ;;  %v3490_v38 = vpop.f32.mrb[1].mxu0  ;;  %v3748_v39 = vpop.f32.mrb[1].mxu1  ;;  %v6003_v34 = vld [vmem:[#allocation13 + $0x40] sm:$0xff] (!%p5031_p2)  }
 0x41b   : > { %v5192_v40 = vadd.f32 %v3490_v38, %v1306_v30  ;;  %v5196_v41 = vadd.f32 %v3748_v39, %v1314_v33  ;;  %v3492_v42 = vpop.f32.mrb[2].mxu0  ;;  %v3750_v28 = vpop.f32.mrb[2].mxu1  ;;  %v6004_v35 = vld [vmem:[#allocation13 + $0xc0] sm:$0xff] (!%p5031_p2)   ;;  %5147 = vmatprep.subr.bf16.mxu0 (!%p5031_p2), %v6003_v34  ;;  %v6007_v38 = vld [vmem:[#allocation13 + $0x48] sm:$0xff] (!%p5031_p2)  }
 0x41c   : > { %v5193_v43 = vadd.f32 %v3492_v42, %v1302_v25  ;;  %v5197_v44 = vadd.f32 %v3750_v28, %v1310_v26  ;;  %v3494_v29 = vpop.f32.mrb[3].mxu0  ;;  %v3752_v45 = vpop.f32.mrb[3].mxu1  ;;  %v3755_v47 = vmax.f32 %v5191_v36, 0.0  ;;  %v3757_v27 = vmax.f32 %v5195_v37, 0.0  ;;  %v6005_v36 = vld [vmem:[#allocation13] sm:$0xff] (!%p5031_p2)   ;;  %5169 = vmatprep.subr.bf16.mxu1 (!%p5031_p2), %v6004_v35  ;;  %v6008_v39 = vld [vmem:[#allocation13 + $0xc8] sm:$0xff] (!%p5031_p2)  }
 0x41d   : > { %v5194_v46 = vadd.f32 %v3494_v29, %v1306_v30  ;;  %v5198_v31 = vadd.f32 %v3752_v45, %v1314_v33  ;;  %v3756_v49 = vmax.f32 %v5192_v40, 0.0  ;;  %v3758_v50 = vmax.f32 %v5196_v41, 0.0  ;;  %3776 = sbr.rel (%p5031_p2) target bundleno = 1324 (0x52c), region = 84  ;;  %v6006_v37 = vld [vmem:[#allocation13 + $0x80] sm:$0xff] (!%p5031_p2)   ;;  %v6009_v40 = vld [vmem:[#allocation13 + $0x8] sm:$0xff] (!%p5031_p2)   ;;  %v6011_v42 = vld [vmem:[#allocation13 + $0x50] sm:$0xff] (!%p5031_p2)  }
 0x41e   : > { %v3759_v32 = vmax.f32 %v5193_v43, 0.0  ;;  %v3761_v48 = vmax.f32 %v5197_v44, 0.0  ;;  %v6010_v41 = vld [vmem:[#allocation13 + $0x88] sm:$0xff] (!%p5031_p2)   ;;  %v6012_v28 = vld [vmem:[#allocation13 + $0xd0] sm:$0xff] (!%p5031_p2)   ;;  %v6015_v29 = vld [vmem:[#allocation13 + $0x58] sm:$0xff] (!%p5031_p2)  }
 0x41f   : > { %v3760_v51 = vmax.f32 %v5194_v46, 0.0  ;;  %v3762_v52 = vmax.f32 %v5198_v31, 0.0  ;;  %v6013_v43 = vld [vmem:[#allocation13 + $0x10] sm:$0xff] (!%p5031_p2)   ;;  %v6016_v45 = vld [vmem:[#allocation13 + $0xd8] sm:$0xff] (!%p5031_p2)  }
 0x420   : > { %v3763_v53 = vpack.c.bf16 %v3759_v32, %v3755_v47  ;;  %v3765_v54 = vpack.c.bf16 %v3761_v48, %v3757_v27  ;;  %v6014_v44 = vld [vmem:[#allocation13 + $0x90] sm:$0xff] (!%p5031_p2)   ;;  %v6017_v46 = vld [vmem:[#allocation13 + $0x18] sm:$0xff] (!%p5031_p2)   ;;  %v6019_v47 = vld [vmem:[#allocation13 + $0x60] sm:$0xff] (!%p5031_p2)  }
 0x421   : > { %v3764_v55 = vpack.c.bf16 %v3760_v51, %v3756_v49  ;;  %v3766_v56 = vpack.c.bf16 %v3762_v52, %v3758_v50  ;;  %v6018_v31 = vld [vmem:[#allocation13 + $0x98] sm:$0xff] (!%p5031_p2)   ;;  %v6020_v27 = vld [vmem:[#allocation13 + $0xe0] sm:$0xff] (!%p5031_p2)   ;;  %v6023_v49 = vld [vmem:[#allocation13 + $0x68] sm:$0xff] (!%p5031_p2)  }
 0x422   : > { %3769 = vst [vmem:[%s3768_s9] sm:$0xff] %v3763_v53  ;;  %3771 = vst [vmem:[%s3768_s9 + $0x10] sm:$0xff] %v3765_v54  ;;  %v6021_v32 = vld [vmem:[#allocation13 + $0x20] sm:$0xff] (!%p5031_p2)   ;;  %v6024_v50 = vld [vmem:[#allocation13 + $0xe8] sm:$0xff] (!%p5031_p2)  }
 0x423   : > { %3770 = vst [vmem:[%s3768_s9 + $0x8] sm:$0xff] %v3764_v55  ;;  %3772 = vst [vmem:[%s3768_s9 + $0x18] sm:$0xff] %v3766_v56  ;;  %v6022_v48 = vld [vmem:[#allocation13 + $0xa0] sm:$0xff] (!%p5031_p2)   ;;  %v6025_v51 = vld [vmem:[#allocation13 + $0x28] sm:$0xff] (!%p5031_p2)  }
 0x424   : > { %v6026_v52 = vld [vmem:[#allocation13 + $0xa8] sm:$0xff]   ;;  %v6027_v53 = vld [vmem:[#allocation13 + $0x70] sm:$0xff]  }
 0x425   : > { %v6028_v54 = vld [vmem:[#allocation13 + $0xf0] sm:$0xff]  }
 0x426   : > { %v6029_v55 = vld [vmem:[#allocation13 + $0x30] sm:$0xff]  }
 0x427   : > { %v6030_v56 = vld [vmem:[#allocation13 + $0xb0] sm:$0xff]  }
 0x42a   : > { %v3847_v25 = vld [vmem:[#allocation3 + $0x28] sm:$0xff]  ;;  %v3849_v26 = vld [vmem:[#allocation3 + $0x38] sm:$0xff]  ;;  %v3846_v30 = vld [vmem:[#allocation3 + $0x20] sm:$0xff] }
 0x42b   : > { %4138 = vmatprep.mubr.bf16.mxu0 %v3847_v25  ;;  %v3848_v33 = vld [vmem:[#allocation3 + $0x30] sm:$0xff]  ;;  %4179 = vmatprep.mubr.bf16.mxu1 %v3849_v26  ;;  %v3778_v61 = vld [vmem:[#allocation3 + $0x8] sm:$0xff]  ;;  %v3780_v62 = vld [vmem:[#allocation3 + $0x18] sm:$0xff] }
 0x42c   : > { %4139 = vmatmul.mubr.bf16.vlgmr.msra.gmra.mrb[0].mxu0 %v3846_v30  ;;  %4180 = vmatmul.mubr.bf16.vlgmr.msra.gmra.mrb[0].mxu1 %v3848_v33  ;;  %v3777_v63 = vld [vmem:[#allocation3] sm:$0xff]  ;;  %v3779_v0 = vld [vmem:[#allocation3 + $0x10] sm:$0xff]  ;;  %v5096_v30 = vld [vmem:[#allocation15] ss:$0 sm:$0xff] }
 0x42d   : > { %5148 = vmatpush3.bf16.msra.mxu0 %v6005_v36  ;;  %5170 = vmatpush3.bf16.msra.mxu1 %v6006_v37 }
 0x42e   : > { %5149 = vmatprep.subr.bf16.mxu0 %v6007_v38  ;;  %5171 = vmatprep.subr.bf16.mxu1 %v6008_v39 }
 0x42f   : > { %4412 = vmatprep.mubr.bf16.mxu0 %v3778_v61  ;;  %4453 = vmatprep.mubr.bf16.mxu1 %v3780_v62 }
 0x431   : > { %5150 = vmatpush3.bf16.msra.mxu0 %v6009_v40  ;;  %5172 = vmatpush3.bf16.msra.mxu1 %v6010_v41 }
 0x432   : > { %5151 = vmatprep.subr.bf16.mxu0 %v6011_v42  ;;  %5173 = vmatprep.subr.bf16.mxu1 %v6012_v28 }
 0x435   : > { %5152 = vmatpush3.bf16.msra.mxu0 %v6013_v43  ;;  %5174 = vmatpush3.bf16.msra.mxu1 %v6014_v44 }
 0x436   : > { %5153 = vmatprep.subr.bf16.mxu0 %v6015_v29  ;;  %5175 = vmatprep.subr.bf16.mxu1 %v6016_v45 }
 0x439   : > { %5154 = vmatpush3.bf16.msra.mxu0 %v6017_v46  ;;  %5176 = vmatpush3.bf16.msra.mxu1 %v6018_v31 }
 0x43a   : > { %5155 = vmatprep.subr.bf16.mxu0 %v6019_v47  ;;  %5177 = vmatprep.subr.bf16.mxu1 %v6020_v27 }
 0x43d   : > { %5156 = vmatpush3.bf16.msra.mxu0 %v6021_v32  ;;  %5178 = vmatpush3.bf16.msra.mxu1 %v6022_v48 }
 0x43e   : > { %5157 = vmatprep.subr.bf16.mxu0 %v6023_v49  ;;  %5179 = vmatprep.subr.bf16.mxu1 %v6024_v50 }
 0x441   : > { %5158 = vmatpush3.bf16.msra.mxu0 %v6025_v51  ;;  %5180 = vmatpush3.bf16.msra.mxu1 %v6026_v52 }
 0x442   : > { %5159 = vmatprep.subr.bf16.mxu0 %v6027_v53  ;;  %5181 = vmatprep.subr.bf16.mxu1 %v6028_v54 }
 0x445   : > { %5160 = vmatpush3.bf16.msra.mxu0 %v6029_v55  ;;  %5182 = vmatpush3.bf16.msra.mxu1 %v6030_v56 }
 0x446   : > { %5161 = vmatprep.subr.bf16.mxu0 %v6031_v57  ;;  %5183 = vmatprep.subr.bf16.mxu1 %v6032_v58 }
 0x449   : > { %5162 = vmatpush3.bf16.msra.mxu0 %v6033_v59  ;;  %5184 = vmatpush3.bf16.msra.mxu1 %v6034_v60 }
 0x44c   : > { %4413 = vmatmul.mubr.bf16.vlgmr.msra.gmra.mrb[4].mxu0 %v3777_v63  ;;  %4454 = vmatmul.mubr.bf16.vlgmr.msra.gmra.mrb[4].mxu1 %v3779_v0 }
 0x4ff   : > { %v5119_v1 = vpop.f32.mrb[0].mxu0  ;;  %v5141_v2 = vpop.f32.mrb[0].mxu1 }
 0x500   : > { %v5120_v3 = vpop.f32.mrb[1].mxu0  ;;  %v5142_v5 = vpop.f32.mrb[1].mxu1 }
 0x501   : > { %v5121_v4 = vadd.f32 %v5120_v3, %v5119_v1  ;;  %v5122_v6 = vpop.f32.mrb[2].mxu0  ;;  %v5143_v7 = vadd.f32 %v5142_v5, %v5141_v2  ;;  %v5144_v8 = vpop.f32.mrb[2].mxu1 }
 0x502   : > { %v5123_v9 = vpop.f32.mrb[3].mxu0  ;;  %v5145_v11 = vpop.f32.mrb[3].mxu1 }
 0x503   : > { %v5124_v10 = vadd.f32 %v5123_v9, %v5122_v6  ;;  %v4182_v12 = vadd.f32 %v5143_v7, %v5121_v4  ;;  %v5146_v13 = vadd.f32 %v5145_v11, %v5144_v8 }
 0x505   : > { %v4185_v14 = vadd.f32 %v5146_v13, %v5124_v10 }
 0x51f   : > { %v5163_v15 = vpop.f32.mrb[4].mxu0  ;;  %v5185_v16 = vpop.f32.mrb[4].mxu1 }
 0x520   : > { %v5164_v17 = vpop.f32.mrb[5].mxu0  ;;  %v5186_v19 = vpop.f32.mrb[5].mxu1 }
 0x521   : > { %v5165_v18 = vadd.f32 %v5164_v17, %v5163_v15  ;;  %v5166_v20 = vpop.f32.mrb[6].mxu0  ;;  %v5187_v21 = vadd.f32 %v5186_v19, %v5185_v16  ;;  %v5188_v22 = vpop.f32.mrb[6].mxu1 }
 0x522   : > { %v5167_v23 = vpop.f32.mrb[7].mxu0  ;;  %v5189_v26 = vpop.f32.mrb[7].mxu1 }
 0x523   : > { %v4415_v24 = vadd.f32 %v5165_v18, %v4182_v12  ;;  %v5168_v25 = vadd.f32 %v5167_v23, %v5166_v20  ;;  %v5190_v33 = vadd.f32 %v5189_v26, %v5188_v22 }
 0x525   : > { %v4456_v34 = vadd.f32 %v5187_v21, %v4415_v24  ;;  %v4418_v35 = vadd.f32 %v5168_v25, %v4185_v14 }
 0x527   : > { %v4469_v36 = vadd.f32 %v5096_v30, %v4456_v34  ;;  %v4459_v37 = vadd.f32 %v5190_v33, %v4418_v35 }
 0x529   : > { %4471 = vst [vmem:[#allocation16] sm:$0xff] %v4469_v36  ;;  %v4470_v38 = vadd.f32 %v5096_v30, %v4459_v37 }
 0x52b   : > { %4472 = vst [vmem:[#allocation16 + $0x8] sm:$0xff] %v4470_v38 }
 0x52c PF: > { %p5307_p10 = scmp.eq.s32.totalorder %s6394_s30, 1  ;;  %s6330_s22 = smov [#allocation16]  }
 0x52d   : > { %s4479_s13 = sshll.u32 %s6330_s22, 4  ;;  %s4480_s13 = int_to_ptr.vmem [resolvable:$true] %s4479_s13 }
 0x52e   : > { %s6233_s29 = scalar_lea.vmem %s4480_s13, 256  ;;  %p6240_p3 = scmp.lt.s32.totalorder %s4480_s13, %s4480_s13 }
 0x52f   : > { %p6234_p8 = scmp.ne.s32.totalorder %s4480_s13, %s6233_s29  ;;  %p6241_p4 = scmp.lt.s32.totalorder %s6233_s29, %s6233_s29 }
 0x531   : > { %p6235_p1 = pnand %p6234_p8, %p5307_p10  ;;  %p6242_p11 = por %p6241_p4, %p6240_p3 }
 0x533   : > { %p6236_p7 = pneg %p6235_p1 }
 0x535   : > { %p6243_p12 = pnand %p6242_p11, %p6236_p7 }
 0x537   : > { %6246 = shalt.err (!%p6243_p12)
}
 0x538   : > { %s6247_s16 = scalar_lea.hbm %s7105_s7, 256 }
 0x539   : > { %p6248_p6 = scmp.ne.s32.totalorder %s7105_s7, %s6247_s16  ;;  %p6253_p5 = scmp.lt.u32.totalorder %s6247_s16, %s7105_s7 }
 0x53b   : > { %p6249_p13 = pnand %p6248_p6, %p5307_p10 }
 0x53d   : > { %p6250_p0 = pneg %p6249_p13 }
 0x53f   : > { %p6255_p9 = pnand %p6253_p5, %p6250_p0 }
 0x541   : > { %6258 = shalt.err (!%p6255_p9)
}
 0x542   : > { %s6331_s24 = smov 128   ;;  %s6332_s14 = smov 8  }
 0x543   : > { %5268 = dma.vmem_to_hbm [thread:$0]  (%p5307_p10), %s4480_s13, 256, %s7105_s7, [#allocation6], %s6331_s24, %s6331_s24, %s6332_s14  }
 0x544   : > { %6296 = dma.done.wait (%p5307_p10), [#allocation6], 256  }
 0x545   : > { %6298 = vsyncadd (%p5307_p10), [#allocation6], 4294967040 }
 0x546 PF: > { %p21_p2 = scmp.ge.s32.totalorder %s6553_s19, 4   ;;  %s7124_s24 = smov %s6305_s25 }
 0x547   : > { %s7125_s25 = smov %s6309_s26  ;;  %s7126_s26 = smov %s6565_s23 }
 0x548   : > { %s7127_s27 = smov %s6553_s19  ;;  %23 = sbr.rel (!%p21_p2) target bundleno = 7 (0x7), region = 121 }
 0x54f   :  { %4495 = vsyncpa [#allocation5], 1 }
 0x550   :  { %4497 = vsyncpa [#allocation5 + $0x1], 1 }
 0x551   :  { %4498 = vsyncpa [#allocation8], 1 }
 0x552   :  { %4499 = vsyncpa [#allocation11], 1 }
 0x553   :  { %4501 = vsyncpa [#allocation11 + $0x1], 1 }
 0x554   :  { %4502 = vsyncpa [#allocation14], 1 }
 0x555   :  { %4503 = vsyncpa [#allocation6], 1 }
 0x556   :  { %4505 = vsyncpa [#allocation6 + $0x1], 1 }

</bundles_post_ra>
